<compile_context>
chip_gen: v7x
topology: tpu7x:2x2x1
jax: 0.10.0
libtpu: 0.0.40
codegen_flags: <defaults>
</compile_context>

<pallas_src>
import functools

import jax
import jax.numpy as jnp
from jax.experimental import pallas as pl
from jax.experimental.pallas import tpu as pltpu


def _round_up(x, m):
    return (x + m - 1) // m * m


def _choose_conv_row_tile(H, W, Cin, Cout_p, d, itemsize, budget_bytes):
    """Largest row-band TH (divisor of H, sublane-friendly TH*W) fitting the VMEM budget."""
    cands = [th for th in range(1, H + 1) if H % th == 0 and (th * W) % 8 == 0]
    if not cands:
        cands = [H]
    best = cands[0]
    for th in cands:
        in_b = (th + 2 * d) * (W + 2 * d) * Cin * itemsize
        out_b = th * W * Cout_p * 4
        lhs_b = th * W * 9 * Cin * 4
        # double-buffered input + output tiles, packed-LHS temp, f32 accumulator
        live = 2 * in_b + 2 * out_b + lhs_b + out_b
        if live <= budget_bytes:
            best = th
    return best


def _choose_bn_row_tile(M, target=2048):
    """Row tile for the flat BN/ReLU pass (~1-2K rows hits the HBM roofline)."""
    if M <= target:
        return M
    for r in range(target, 7, -1):
        if M % r == 0 and r % 8 == 0:
            return r
    return M  # fallback: single block (awkward M)


def conv_stats_kernel(x_ref, w_ref, out_ref, sum_ref, ssq_ref, *, TH, W, Cin, Cout_p, d):
    """3x3 dilated conv on one (image, row-band) tile + per-tile channel statistics.

    x_ref   : (1, 1, TH+2d, W+2d, Cin)   pre-tiled, zero-padded input band (channels-last)
    w_ref   : (9*Cin, Cout_p)            conv taps packed along K in (kh, kw, cin) order
    out_ref : (TH*W, Cout_p)             conv output rows (flat, lane-dense), f32
    sum_ref : (1, 1, 8, Cout_p)          per-tile channel sum (replicated over sublanes)
    ssq_ref : (1, 1, 8, Cout_p)          per-tile channel sum of squares
    """
    xp = x_ref[0, 0]                                         # (TH+2d, W+2d, Cin)

    # Pack the 9 shifted patches along the contraction axis -> one big MXU matmul.
    taps = []
    for kh in range(3):
        for kw in range(3):
            patch = xp[kh * d:kh * d + TH, kw * d:kw * d + W, :]   # (TH, W, Cin)
            taps.append(patch.reshape(TH * W, Cin))
    lhs = jnp.concatenate(taps, axis=-1)                     # (TH*W, 9*Cin)

    acc = jnp.dot(lhs, w_ref[...], preferred_element_type=jnp.float32)  # (TH*W, Cout_p)
    # NOTE: conv bias is intentionally omitted - train-mode BatchNorm subtracts the
    # batch mean, which absorbs a per-channel constant exactly.
    out_ref[...] = acc

    # Per-tile partial statistics (no cross-grid resident accumulator -> grid axes
    # can be "parallel" / megacore-sharded).  E[x^2]-E[x]^2 cancellation is handled
    # by clamping the variance in the wrapper glue.
    ps = jnp.sum(acc, axis=0, keepdims=True)                 # (1, Cout_p)
    pss = jnp.sum(acc * acc, axis=0, keepdims=True)          # (1, Cout_p)
    sum_ref[...] = jnp.broadcast_to(ps.reshape(1, 1, 1, Cout_p), (1, 1, 8, Cout_p))
    ssq_ref[...] = jnp.broadcast_to(pss.reshape(1, 1, 1, Cout_p), (1, 1, 8, Cout_p))


def bn_relu_kernel(y_ref, scale_ref, shift_ref, out_ref):
    """Flat, lane-dense BN(fold) + ReLU: out = max(y*scale + shift, 0)."""
    y = y_ref[...]                                           # (R, Cout_p) f32
    out_ref[...] = jnp.maximum(y * scale_ref[...] + shift_ref[...], 0.0).astype(out_ref.dtype)


def rebnconv_forward(x_nchw, w_oihw, bias, gamma, beta, *, dirate=1, eps=1e-5,
                     row_tile=None, bn_row_tile=None, matmul_dtype=jnp.float32):
    """Forward pass of REBNCONV (training-mode BatchNorm, i.e. batch statistics).

    matmul_dtype=jnp.bfloat16 halves conv input/weight DMA bytes and hits the bf16
    MXU peak on v5e/v6e/v7x (accumulation stays f32); default f32 keeps exact parity
    with PyTorch float32 Conv2d.
    """
    N, Cin, H, W = x_nchw.shape
    Cout = w_oihw.shape[0]
    d = int(dirate)
    Cout_p = _round_up(Cout, 128)          # lane-dense outputs -> unmasked vst
    itemsize = jnp.dtype(matmul_dtype).itemsize

    # `bias` is not used inside the kernels: it cancels exactly under train-mode BN
    # (the batch mean includes it), so the final ReLU(BN(conv+b)) is unchanged.
    del bias

    if row_tile is None:
        row_tile = _choose_conv_row_tile(H, W, Cin, Cout_p, d, itemsize,
                                         budget_bytes=12 << 20)  # fits v7x 64 MiB easily
    TH = int(row_tile)
    assert H % TH == 0, "row_tile must divide H"
    n_tiles = H // TH
    Hp, Wp = H + 2 * d, W + 2 * d
    M = N * H * W

    # ---- glue: layout conversion, zero pad, halo row-band pre-tiling ---------------
    x_nhwc = jnp.transpose(x_nchw, (0, 2, 3, 1)).astype(matmul_dtype)
    x_pad = jnp.pad(x_nhwc, ((0, 0), (d, d), (d, d), (0, 0)))
    # Overlapping row bands (halo = 2d rows) so the kernel only ever holds a small
    # slab; XLA fuses transpose+pad+slice/stack into one producer pass.
    # TODO(synk): replace wrapper-side halo materialization with in-kernel halo DMA
    # (memory_space=pl.ANY + make_async_copy) to drop the duplicated-halo HBM bytes.
    x_tiles = jnp.stack(
        [x_pad[:, t * TH:t * TH + TH + 2 * d] for t in range(n_tiles)],
        axis=1)                                              # (N, n_tiles, TH+2d, Wp, Cin)

    # Pack 3x3 taps along K ((kh, kw, cin) order) and zero-pad Cout to Cout_p.
    w_hwio = jnp.transpose(w_oihw, (2, 3, 1, 0)).astype(jnp.float32)     # (3,3,Cin,Cout)
    w_packed = jnp.pad(w_hwio, ((0, 0), (0, 0), (0, 0), (0, Cout_p - Cout)))
    w_packed = w_packed.reshape(9 * Cin, Cout_p).astype(matmul_dtype)    # (9*Cin, Cout_p)

    conv_flops = 2 * N * H * W * 9 * Cin * Cout_p
    conv_bytes = (x_tiles.size * itemsize + w_packed.size * itemsize
                  + M * Cout_p * 4 + 2 * N * n_tiles * 8 * Cout_p * 4)

    conv_flat, psum, pssq = pl.pallas_call(
        functools.partial(conv_stats_kernel, TH=TH, W=W, Cin=Cin, Cout_p=Cout_p, d=d),
        out_shape=(
            jax.ShapeDtypeStruct((M, Cout_p), jnp.float32),
            jax.ShapeDtypeStruct((N, n_tiles, 8, Cout_p), jnp.float32),
            jax.ShapeDtypeStruct((N, n_tiles, 8, Cout_p), jnp.float32),
        ),
        grid_spec=pltpu.PrefetchScalarGridSpec(
            num_scalar_prefetch=0,
            grid=(N, n_tiles),
            in_specs=[
                pl.BlockSpec((1, 1, TH + 2 * d, Wp, Cin), lambda n, t: (n, t, 0, 0, 0)),
                pl.BlockSpec((9 * Cin, Cout_p), lambda n, t: (0, 0)),
            ],
            out_specs=[
                pl.BlockSpec((TH * W, Cout_p), lambda n, t, nt=n_tiles: (n * nt + t, 0)),
                pl.BlockSpec((1, 1, 8, Cout_p), lambda n, t: (n, t, 0, 0)),
                pl.BlockSpec((1, 1, 8, Cout_p), lambda n, t: (n, t, 0, 0)),
            ],
        ),
        compiler_params=pltpu.CompilerParams(
            dimension_semantics=("parallel", "parallel"),   # no resident accumulator
            vmem_limit_bytes=32 * 1024 * 1024),
        cost_estimate=pl.CostEstimate(flops=conv_flops, transcendentals=0,
                                      bytes_accessed=conv_bytes),
    )(x_tiles, w_packed)

    # ---- glue: tiny (tiles, C) reduction -> folded BN scale/shift ------------------
    count = jnp.float32(N * H * W)
    ch_sum = jnp.sum(psum[:, :, 0, :], axis=(0, 1))          # (Cout_p,)
    ch_ssq = jnp.sum(pssq[:, :, 0, :], axis=(0, 1))
    mean = ch_sum / count
    var = jnp.maximum(ch_ssq / count - mean * mean, 0.0)     # biased var (PyTorch BN fwd)
    gamma_p = jnp.pad(gamma.astype(jnp.float32), (0, Cout_p - Cout))
    beta_p = jnp.pad(beta.astype(jnp.float32), (0, Cout_p - Cout))
    scale = gamma_p * jax.lax.rsqrt(var + eps)
    shift = beta_p - mean * scale

    # ---- flat, memory-bound BN + ReLU pass -----------------------------------------
    if bn_row_tile is None:
        bn_row_tile = _choose_bn_row_tile(M)
    R = int(bn_row_tile)
    assert M % R == 0, "bn_row_tile must divide N*H*W"

    y_flat = pl.pallas_call(
        bn_relu_kernel,
        out_shape=jax.ShapeDtypeStruct((M, Cout_p), jnp.float32),
        grid_spec=pltpu.PrefetchScalarGridSpec(
            num_scalar_prefetch=0,
            grid=(M // R,),
            in_specs=[
                pl.BlockSpec((R, Cout_p), lambda i: (i, 0)),
                pl.BlockSpec((1, Cout_p), lambda i: (0, 0)),
                pl.BlockSpec((1, Cout_p), lambda i: (0, 0)),
            ],
            out_specs=pl.BlockSpec((R, Cout_p), lambda i: (i, 0)),
        ),
        compiler_params=pltpu.CompilerParams(
            dimension_semantics=("parallel",),
            vmem_limit_bytes=32 * 1024 * 1024),
        cost_estimate=pl.CostEstimate(flops=2 * M * Cout_p, transcendentals=0,
                                      bytes_accessed=2 * M * Cout_p * 4),
    )(conv_flat, scale.reshape(1, Cout_p), shift.reshape(1, Cout_p))

    # Back to NCHW (PyTorch convention), dropping the padded channels.
    y = y_flat.reshape(N, H, W, Cout_p)[:, :, :, :Cout]
    return jnp.transpose(y, (0, 3, 1, 2))


def rebnconv_reference(x_nchw, w_oihw, bias, gamma, beta, *, dirate=1, eps=1e-5):
    d = dirate
    conv = jax.lax.conv_general_dilated(
        x_nchw.astype(jnp.float32), w_oihw.astype(jnp.float32),
        window_strides=(1, 1), padding=[(d, d), (d, d)],
        rhs_dilation=(d, d),
        dimension_numbers=("NCHW", "OIHW", "NCHW"))
    conv = conv + bias[None, :, None, None]
    mean = conv.mean(axis=(0, 2, 3))
    var = conv.var(axis=(0, 2, 3))  # biased
    norm = (conv - mean[None, :, None, None]) * jax.lax.rsqrt(var + eps)[None, :, None, None]
    return jnp.maximum(norm * gamma[None, :, None, None] + beta[None, :, None, None], 0.0)


if __name__ == "__main__":
    key = jax.random.PRNGKey(0)
    k_x, k_w, k_b, k_g, k_be = jax.random.split(key, 5)

    N, Cin, Cout, H, W = 2, 4, 8, 16, 16
    dirate = 1

    x = jax.random.normal(k_x, (N, Cin, H, W), dtype=jnp.float32)
    # Deterministic synthetic parameters (shapes match nn.Conv2d/BatchNorm2d __init__).
    w = jax.random.normal(k_w, (Cout, Cin, 3, 3), dtype=jnp.float32) * 0.1
    b = jax.random.normal(k_b, (Cout,), dtype=jnp.float32) * 0.1
    gamma = 1.0 + 0.1 * jax.random.normal(k_g, (Cout,), dtype=jnp.float32)
    beta = 0.1 * jax.random.normal(k_be, (Cout,), dtype=jnp.float32)

    ref = rebnconv_reference(x, w, b, gamma, beta, dirate=dirate)

    # Forced 2-band tiling (exercises the halo path) and auto-tiled path.
    out_tiled = jax.block_until_ready(
        rebnconv_forward(x, w, b, gamma, beta, dirate=dirate, row_tile=8))
    out_auto = jax.block_until_ready(
        rebnconv_forward(x, w, b, gamma, beta, dirate=dirate))

    for out in (out_tiled, out_auto):
        assert out.shape == (N, Cout, H, W)
        err = float(jnp.max(jnp.abs(out - ref)))
        assert jnp.allclose(out, ref, atol=1e-4, rtol=1e-4), err

    print("KERNEL_OK")
</pallas_src>

<mosaic_0001>
module attributes {stable_mosaic.version = 11 : i64} {
  func.func @conv_stats_kernel(%arg0: i32, %arg1: i32, %arg2: memref<1x1x10x18x4xf32, #tpu.memory_space<vmem>>, %arg3: memref<36x128xf32, #tpu.memory_space<vmem>>, %arg4: memref<128x128xf32, #tpu.memory_space<vmem>>, %arg5: memref<1x1x8x128xf32, #tpu.memory_space<vmem>>, %arg6: memref<1x1x8x128xf32, #tpu.memory_space<vmem>>) attributes {dimension_semantics = [#tpu.dimension_semantics<parallel>, #tpu.dimension_semantics<parallel>], iteration_bounds = array<i64: 2, 2>, scalar_prefetch = 0 : i64, scratch_operands = 0 : i64, tpu.core_type = #tpu.core_type<tc>, window_params = [{transform_indices = @transform_0, window_bounds = array<i64: 1, 1, 10, 18, 4>}, {pipeline_mode = #tpu.pipeline_mode<synchronous>, transform_indices = @transform_1, window_bounds = array<i64: 36, 128>}, {transform_indices = @transform_2, window_bounds = array<i64: 128, 128>}, {transform_indices = @transform_3, window_bounds = array<i64: 1, 1, 8, 128>}, {transform_indices = @transform_4, window_bounds = array<i64: 1, 1, 8, 128>}]} {
    %c0 = arith.constant 0 : index
    %c0_0 = arith.constant 0 : index
    %c0_1 = arith.constant 0 : index
    %c0_2 = arith.constant 0 : index
    %c0_3 = arith.constant 0 : index
    %0 = vector.load %arg2[%c0, %c0_0, %c0_1, %c0_2, %c0_3] : memref<1x1x10x18x4xf32, #tpu.memory_space<vmem>>, vector<1x1x10x18x4xf32>
    %1 = vector.shape_cast %0 : vector<1x1x10x18x4xf32> to vector<10x18x4xf32>
    %2 = vector.extract_strided_slice %1 {offsets = [0, 0, 0], sizes = [8, 16, 4], strides = [1, 1, 1]} : vector<10x18x4xf32> to vector<8x16x4xf32>
    %3 = vector.shape_cast %2 : vector<8x16x4xf32> to vector<128x4xf32>
    %4 = vector.extract_strided_slice %1 {offsets = [0, 1, 0], sizes = [8, 16, 4], strides = [1, 1, 1]} : vector<10x18x4xf32> to vector<8x16x4xf32>
    %5 = vector.shape_cast %4 : vector<8x16x4xf32> to vector<128x4xf32>
    %6 = vector.extract_strided_slice %1 {offsets = [0, 2, 0], sizes = [8, 16, 4], strides = [1, 1, 1]} : vector<10x18x4xf32> to vector<8x16x4xf32>
    %7 = vector.shape_cast %6 : vector<8x16x4xf32> to vector<128x4xf32>
    %8 = vector.extract_strided_slice %1 {offsets = [1, 0, 0], sizes = [8, 16, 4], strides = [1, 1, 1]} : vector<10x18x4xf32> to vector<8x16x4xf32>
    %9 = vector.shape_cast %8 : vector<8x16x4xf32> to vector<128x4xf32>
    %10 = vector.extract_strided_slice %1 {offsets = [1, 1, 0], sizes = [8, 16, 4], strides = [1, 1, 1]} : vector<10x18x4xf32> to vector<8x16x4xf32>
    %11 = vector.shape_cast %10 : vector<8x16x4xf32> to vector<128x4xf32>
    %12 = vector.extract_strided_slice %1 {offsets = [1, 2, 0], sizes = [8, 16, 4], strides = [1, 1, 1]} : vector<10x18x4xf32> to vector<8x16x4xf32>
    %13 = vector.shape_cast %12 : vector<8x16x4xf32> to vector<128x4xf32>
    %14 = vector.extract_strided_slice %1 {offsets = [2, 0, 0], sizes = [8, 16, 4], strides = [1, 1, 1]} : vector<10x18x4xf32> to vector<8x16x4xf32>
    %15 = vector.shape_cast %14 : vector<8x16x4xf32> to vector<128x4xf32>
    %16 = vector.extract_strided_slice %1 {offsets = [2, 1, 0], sizes = [8, 16, 4], strides = [1, 1, 1]} : vector<10x18x4xf32> to vector<8x16x4xf32>
    %17 = vector.shape_cast %16 : vector<8x16x4xf32> to vector<128x4xf32>
    %18 = vector.extract_strided_slice %1 {offsets = [2, 2, 0], sizes = [8, 16, 4], strides = [1, 1, 1]} : vector<10x18x4xf32> to vector<8x16x4xf32>
    %19 = vector.shape_cast %18 : vector<8x16x4xf32> to vector<128x4xf32>
    %20 = tpu.concatenate %3, %5, %7, %9, %11, %13, %15, %17, %19 in 1 : vector<128x4xf32>, vector<128x4xf32>, vector<128x4xf32>, vector<128x4xf32>, vector<128x4xf32>, vector<128x4xf32>, vector<128x4xf32>, vector<128x4xf32>, vector<128x4xf32> -> vector<128x36xf32>
    %c0_4 = arith.constant 0 : index
    %c0_5 = arith.constant 0 : index
    %21 = vector.load %arg3[%c0_4, %c0_5] : memref<36x128xf32, #tpu.memory_space<vmem>>, vector<36x128xf32>
    %cst = arith.constant dense<0.000000e+00> : vector<128x128xf32>
    %22 = tpu.matmul %20, %21, %cst {dimension_numbers = #tpu.dot_dimension_numbers<[1], [0], [0], [1], [0, 0, 1, 1], [], []>} : vector<128x36xf32>, vector<36x128xf32>, vector<128x128xf32> -> vector<128x128xf32>
    %c0_6 = arith.constant 0 : index
    %c0_7 = arith.constant 0 : index
    %23 = vector.load %arg4[%c0_6, %c0_7] : memref<128x128xf32, #tpu.memory_space<vmem>>, vector<128x128xf32>
    tpu.vector_store %arg4[%c0_6, %c0_7], %22 {strides = array<i32>} : memref<128x128xf32, #tpu.memory_space<vmem>>, vector<128x128xf32>,
    %cst_8 = arith.constant dense<0.000000e+00> : vector<128xf32>
    %24 = vector.multi_reduction <add>, %22, %cst_8 [0] : vector<128x128xf32> to vector<128xf32>
    %25 = vector.shape_cast %24 : vector<128xf32> to vector<1x128xf32>
    %26 = arith.mulf %22, %22 : vector<128x128xf32>
    %cst_9 = arith.constant dense<0.000000e+00> : vector<128xf32>
    %27 = vector.multi_reduction <add>, %26, %cst_9 [0] : vector<128x128xf32> to vector<128xf32>
    %28 = vector.shape_cast %27 : vector<128xf32> to vector<1x128xf32>
    %29 = vector.shape_cast %25 : vector<1x128xf32> to vector<1x1x1x128xf32>
    %30 = vector.shape_cast %29 : vector<1x1x1x128xf32> to vector<1x1x1x128xf32>
    %31 = vector.broadcast %30 : vector<1x1x1x128xf32> to vector<1x1x8x128xf32>
    %c0_10 = arith.constant 0 : index
    %c0_11 = arith.constant 0 : index
    %c0_12 = arith.constant 0 : index
    %c0_13 = arith.constant 0 : index
    %32 = vector.load %arg5[%c0_10, %c0_11, %c0_12, %c0_13] : memref<1x1x8x128xf32, #tpu.memory_space<vmem>>, vector<1x1x8x128xf32>
    tpu.vector_store %arg5[%c0_10, %c0_11, %c0_12, %c0_13], %31 {strides = array<i32>} : memref<1x1x8x128xf32, #tpu.memory_space<vmem>>, vector<1x1x8x128xf32>,
    %33 = vector.shape_cast %28 : vector<1x128xf32> to vector<1x1x1x128xf32>
    %34 = vector.shape_cast %33 : vector<1x1x1x128xf32> to vector<1x1x1x128xf32>
    %35 = vector.broadcast %34 : vector<1x1x1x128xf32> to vector<1x1x8x128xf32>
    %c0_14 = arith.constant 0 : index
    %c0_15 = arith.constant 0 : index
    %c0_16 = arith.constant 0 : index
    %c0_17 = arith.constant 0 : index
    %36 = vector.load %arg6[%c0_14, %c0_15, %c0_16, %c0_17] : memref<1x1x8x128xf32, #tpu.memory_space<vmem>>, vector<1x1x8x128xf32>
    tpu.vector_store %arg6[%c0_14, %c0_15, %c0_16, %c0_17], %35 {strides = array<i32>} : memref<1x1x8x128xf32, #tpu.memory_space<vmem>>, vector<1x1x8x128xf32>,
    return
  }
  func.func @transform_0(%arg0: i32, %arg1: i32) -> (i32, i32, i32, i32, i32) {
    %c0_i32 = arith.constant 0 : i32
    %c0_i32_0 = arith.constant 0 : i32
    %c0_i32_1 = arith.constant 0 : i32
    %c0_i32_2 = arith.constant 0 : i32
    return %arg0, %arg1, %c0_i32, %c0_i32_0, %c0_i32_1 : i32, i32, i32, i32, i32
  }
  func.func @transform_1(%arg0: i32, %arg1: i32) -> (i32, i32) {
    %c0_i32 = arith.constant 0 : i32
    %c0_i32_0 = arith.constant 0 : i32
    %c0_i32_1 = arith.constant 0 : i32
    return %c0_i32, %c0_i32_0 : i32, i32
  }
  func.func @transform_2(%arg0: i32, %arg1: i32) -> (i32, i32) {
    %c2_i32 = arith.constant 2 : i32
    %0 = arith.muli %arg0, %c2_i32 : i32
    %1 = arith.addi %0, %arg1 : i32
    %c0_i32 = arith.constant 0 : i32
    %c0_i32_0 = arith.constant 0 : i32
    return %1, %c0_i32 : i32, i32
  }
  func.func @transform_3(%arg0: i32, %arg1: i32) -> (i32, i32, i32, i32) {
    %c0_i32 = arith.constant 0 : i32
    %c0_i32_0 = arith.constant 0 : i32
    %c0_i32_1 = arith.constant 0 : i32
    return %arg0, %arg1, %c0_i32, %c0_i32_0 : i32, i32, i32, i32
  }
  func.func @transform_4(%arg0: i32, %arg1: i32) -> (i32, i32, i32, i32) {
    %c0_i32 = arith.constant 0 : i32
    %c0_i32_0 = arith.constant 0 : i32
    %c0_i32_1 = arith.constant 0 : i32
    return %arg0, %arg1, %c0_i32, %c0_i32_0 : i32, i32, i32, i32
  }
}

</mosaic_0001>

<bundles_post_ra>
// kernel: tpu_custom_call.1
= control target key start
LH: loop header
LB: loop body
LE: loop exit
PB: predicated region body
PF: predicated region fallthrough
CT: control target
= control target key end

     0   :  { %s2725_s0 = inlined_call_operand.vmem [shape: f32[2,2,10,18,4], index: 0, kind: input, shape index: {}]   ;;  %s2726_s1 = inlined_call_operand.vmem [shape: f32[36,128], index: 1, kind: input, shape index: {}]   ;;  %s2727_s2 = inlined_call_operand.hbm [shape: f32[512,128], index: 2, kind: output, shape index: {0}]   ;;  %s2728_s3 = inlined_call_operand.hbm [shape: f32[2,2,8,128], index: 3, kind: output, shape index: {1}]   ;;  %s2729_s4 = inlined_call_operand.hbm [shape: f32[2,2,8,128], index: 4, kind: output, shape index: {2}]  }
   0x1   :  { %2742 = sst [smem:[#allocation11_spill]] %s2725_s0 }
   0x2   :  { %2743 = sst [smem:[#allocation12_spill]] %s2726_s1 }
   0x3   :  { %2744 = sst [smem:[#allocation13_spill]] %s2729_s4 }
   0x4   :  { %10 = vsyncpa [#allocation3], 0 }
   0x5   :  { %12 = vsyncpa [#allocation3 + $0x1], 0 }
   0x6   :  { %13 = vsyncpa [#allocation5], 0 }
   0x7   :  { %15 = vsyncpa [#allocation5 + $0x1], 0  ;;  %s1860_s15 = smov 0   ;;  %s1862_s16 = smov 0  }
   0x8   :  { %s1864_s17 = smov 0   ;;  %s1866_s18 = smov 0  }
   0x9   :  { %s1868_s19 = smov 0   ;;  %s1870_s20 = smov 0  }
   0xa   :  { %s1872_s21 = smov 0   ;;  %s1874_s22 = smov 0  }
   0xb   :  { %s1876_s23 = smov 0   ;;  %s1878_s24 = smov 0  }
   0xc   :  { %s1880_s25 = smov 0  }
   0xd LB: > { %2745 = sst [smem:[#allocation9_spill]] %s1793_s18  ;;  %s2731_s26 = sadd.s32 4294967295, %s1821_s25   ;;  %s1821_s25 = sphi %s1880_s25, %s21_s25   ;;  %s1817_s24 = sphi %s1878_s24, %s2772_s24   ;;  %s1813_s23 = sphi %s1876_s23, %s2771_s23   ;;  %s1809_s22 = sphi %s1874_s22, %s2770_s22   ;;  %s1805_s21 = sphi %s1872_s21, %s2763_s21   ;;  %s1801_s20 = sphi %s1870_s20, %s2769_s20   ;;  %s1797_s19 = sphi %s1868_s19, %s2768_s19   ;;  %s1793_s18 = sphi %s1866_s18, %s2767_s18   ;;  %s1789_s17 = sphi %s1864_s17, %s2766_s17   ;;  %s1785_s16 = sphi %s1862_s16, %s2765_s16   ;;  %s1781_s15 = sphi %s1860_s15, %s2764_s15  }
   0xe   : > { %2746 = sst [smem:[#allocation10_spill]] %s1813_s23  ;;  %s2730_s27 = sadd.s32 4294967294, %s1821_s25  }
   0xf   : > { %s30_s28 = sadd.s32 1, %s1813_s23  ;;  %s33_s29 = sadd.s32 1, %s1817_s24 }
  0x10   : > { %p31_p0 = scmp.ge.s32.totalorder %s30_s28, 2  ;;  %s1419_s30 = sshll.u32 %s1817_s24, 1 }
  0x11   : > { %s87_s5 = sadd.s32 %s1813_s23, %s1419_s30  ;;  %s93_s6 = sadd.s32 1, %s1801_s20 }
  0x12   : > { %s2774_s28 = smov (%p31_p0, %s30_s28), 0  ;;  %s2776_s29 = smov (!%p31_p0, %s33_s29), %s1817_s24 }
  0x13   : > { %p103_p1 = scmp.ne.s32.totalorder %s1801_s20, %s1797_s19  ;;  %p1929_p2 = scmp.eq.s32.totalorder %s2731_s26, 3 }
  0x14   : > { %p35_p3 = scmp.ge.s32.totalorder %s2776_s29, 2  ;;  %p109_p4 = scmp.ne.s32.totalorder %s1797_s19, %s1793_s18 }
  0x15   : > { %p1937_p5 = por %p1929_p2, %p103_p1  ;;  %p1943_p6 = scmp.eq.s32.totalorder %s2730_s27, 3 }
  0x16   : > { %s2778_s29 = smov (%p35_p3, %s2776_s29), 0  ;;  %s117_s11 = ssub.s32 %s1813_s23, %s2774_s28 }
  0x17   : > { %p1951_p7 = por %p1943_p6, %p109_p4  ;;  %s1420_s12 = sshll.u32 %s2778_s29, 1 }
  0x18   : > { %s116_s13 = ssub.s32 %s1817_s24, %s2778_s29  ;;  %s89_s14 = sadd.s32 %s1420_s12, %s2774_s28 }
  0x19   : > { %s118_s30 = sor.u32 %s117_s11, %s116_s13  ;;  %s90_s27 = ssub.s32 %s87_s5, %s89_s14 }
  0x1a   : > { %p119_p8 = scmp.eq.s32.totalorder %s118_s30, 0  ;;  %p91_p9 = scmp.eq.s32.totalorder %s90_s27, 0 }
  0x1b   : > { %s121_s26 = sadd.s32 1, %s1789_s17  ;;  %p131_p10 = scmp.ne.s32.totalorder %s1789_s17, %s1785_s16 }
  0x1c   : > { %s1963_s18 = scalar_select %p119_p8, %s1789_s17, %s121_s26  }
  0x1d   : > { %s1966_s4 = scalar_select %p91_p9, %s1801_s20, %s93_s6  }
  0x1e   : > { %p137_p11 = scmp.ne.s32.totalorder %s1785_s16, %s1781_s15  ;;  %p1423_p12 = scmp.ge.s32.totalorder %s1821_s25, 1 }
  0x1f   : > { %p199_p13 = scmp.lt.s32.totalorder %s1821_s25, 5  ;;  %p1976_p0 = por %p131_p10, %p1929_p2 }
  0x20   : > { %p1982_p1 = por %p137_p11, %p1943_p6 }
  0x21   : > { %p200_p3 = pnand %p1423_p12, %p199_p13 }
  0x22   : > { %p239_p4 = scmp.lt.s32.totalorder (!%p200_p3), %s1809_s22, 1  ;;  %p241_p8 = scmp.lt.s32.totalorder (!%p200_p3), %s1805_s21, 1  ;;  %vm346_vm0 = vcmask (!%p200_p3), 1045504   ;;  %vm305_vm1 = vcmask (!%p200_p3), 1046528   ;;  %vm987_vm2 = vcmask (!%p200_p3), 1043456   ;;  %vm797_vm3 = vcmask (!%p200_p3), 31744  }
  0x23   : > { %203 = sbr.rel (%p200_p3) target bundleno = 699 (0x2bb), region = 28  ;;  %s2753_s0 = sld [smem:[#allocation11_spill]] (!%p200_p3)  ;;  %vm814_vm4 = vcmask (!%p200_p3), 64512   ;;  %vm831_vm5 = vcmask (!%p200_p3), 97280   ;;  %vm848_vm6 = vcmask (!%p200_p3), 130048   ;;  %vm865_vm7 = vcmask (!%p200_p3), 162816  }
  0x24   : > { %s1823_s14 = smov (!%p200_p3), 12   ;;  %s2737_s30 = smov (!%p200_p3), 8   ;;  %vm882_vm8 = vcmask (!%p200_p3), 195584   ;;  %vm899_vm9 = vcmask (!%p200_p3), 228352   ;;  %vm916_vm10 = vcmask (!%p200_p3), 261120   ;;  %vm938_vm11 = vcmask (!%p200_p3), 293888  }
  0x25   : > { %s2754_s1 = sld [smem:[#allocation12_spill]] (!%p200_p3)  ;;  %s1828_s9 = smov (!%p200_p3), 24  }
  0x2a   : > { %s240_s15 = scalar_select %p239_p4, %s1809_s22, 1 }
  0x2b   : > { %s242_s26 = scalar_select %p241_p8, %s1805_s21, 1  ;;  %v933_v28 = vld [vmem:[%s2754_s1] sm:$0xff]  ;;  %v934_v29 = vld [vmem:[%s2754_s1 + $0x8] sm:$0xff]  ;;  %v935_v33 = vld [vmem:[%s2754_s1 + $0x10] sm:$0xff] }
  0x2c   : > { %s1528_s27 = smul.u32 60, %s240_s15  ;;  %s2739_s15 = smov 4   ;;  %v1513_v30 = vpack.c.bf16 %v934_v29, %v933_v28  ;;  %v936_v34 = vld [vmem:[%s2754_s1 + $0x18] sm:$0xff]  ;;  %v937_v38 = vld [vmem:[%s2754_s1 + $0x20] sm:$0xf] }
  0x2d   : > { %s1527_s5 = smul.u32 30, %s242_s26  ;;  %s1826_s26 = smov 16   ;;  %v1517_v36 = vpack.c.bf16 %v936_v34, %v935_v33 }
  0x2e   : > { %1514 = vmatprep.subr.bf16.mxu0 %v1513_v30  ;;  %1521 = vmatprep.subr.bf16.mxu1 %v1513_v30 }
  0x2f   : > { %s245_s6 = sadd.s32 %s1528_s27, %s1527_s5  ;;  %s2735_s27 = smov 20   ;;  %1516 = vmatpush3.bf16.msra.mxu0 %v1513_v30  ;;  %1524 = vmatpush3.bf16.msra.mxu1 %v1513_v30 }
  0x30   : > { %s1427_s7 = sshll.u32 %s245_s6, 3  ;;  %1518 = vmatprep.subr.bf16.mxu0 %v1517_v36  ;;  %1522 = vmatprep.subr.bf16.mxu1 %v1517_v36  ;;  %s2756_s5 = smov 20  }
  0x31   : > { %s1993_s13 = scalar_lea.vmem %s2753_s0, %s1427_s7  ;;  %s2757_s6 = smov 8  }
  0x32   : > { %v1996_v0 = vld [vmem:[%s1993_s13 + $0x20] sm:$0xff]  ;;  %v1999_v1 = vld [vmem:[%s1993_s13 + $0x18] sm:$0xff]  ;;  %v2009_v3 = vld [vmem:[%s1993_s13 + $0x8] sm:$0xff] }
  0x33   : > { %v2002_v2 = vld [vmem:[%s1993_s13] sm:$0xff]  ;;  %511 = vrot.lane.b32.xlu1 %v1996_v0, %s1823_s14  ;;  %509 = vrot.lane.b32.xlu0 %v1999_v1, %s1823_s14  ;;  %v253_v6 = vld [vmem:[%s1993_s13 + $0x10] sm:$0x3]  ;;  %v348_v7 = vrot.slane %v2009_v3, 2  ;;  %v307_v8 = vrot.slane %v2009_v3, 1  ;;  %v311_v15 = vrot.slane %v1999_v1, 1 }
  0x34   : > { %v347_v4 = vrot.slane %v2002_v2, 2  ;;  %v306_v5 = vrot.slane %v2002_v2, 1  ;;  %v350_v9 = vrot.slane %v253_v6, 2  ;;  %v309_v10 = vrot.slane %v253_v6, 1  ;;  %v256_v17 = vld [vmem:[%s1993_s13 + $0x28] sm:$0x3]  ;;  %1520 = vmatpush3.bf16.msra.mxu0 %v1517_v36  ;;  %1525 = vmatpush3.bf16.msra.mxu1 %v1517_v36 }
  0x35   : > { %v312_v16 = vrot.slane %v1996_v0, 1  ;;  %v352_v19 = vrot.slane %v1999_v1, 2  ;;  %v353_v20 = vrot.slane %v1996_v0, 2  ;;  %v314_v21 = vrot.slane %v256_v17, 1  ;;  %v2039_v25 = vld [vmem:[%s1993_s13 + $0x30] sm:$0xff]  ;;  %v2043_v27 = vld [vmem:[%s1993_s13 + $0x38] sm:$0xff]  ;;  %1487 = vmatprep.subr.msk.mxu0 %vm987_vm2, %v937_v38  ;;  %1523 = vmatprep.subr.msk.mxu1 %vm987_vm2, %v937_v38 }
  0x36   : > { %v349_v11 = vsel %vm346_vm0, %v347_v4, %v348_v7  ;;  %v308_v12 = vsel %vm305_vm1, %v306_v5, %v307_v8  ;;  %v351_v13 = vsel %vm346_vm0, %v348_v7, %v350_v9  ;;  %v310_v14 = vsel %vm305_vm1, %v307_v8, %v309_v10  ;;  %v259_v37 = vld [vmem:[%s1993_s13 + $0x40] sm:$0x3]  ;;  %v2090_v46 = vld [vmem:[%s1993_s13 + $0x48] sm:$0xff]  ;;  %v2093_v47 = vld [vmem:[%s1993_s13 + $0x50] sm:$0xff] }
  0x37   : > { %461 = vrot.lane.b32.xlu1 %v349_v11, %s2737_s30  ;;  %413 = vrot.lane.b32.xlu0 %v308_v12, %s2739_s15  ;;  %v313_v18 = vsel %vm305_vm1, %v311_v15, %v312_v16  ;;  %v354_v22 = vsel %vm346_vm0, %v352_v19, %v353_v20  ;;  %v315_v23 = vsel %vm305_vm1, %v312_v16, %v314_v21  ;;  %v355_v24 = vrot.slane %v256_v17, 2  ;;  %v262_v51 = vld [vmem:[%s1993_s13 + $0x58] sm:$0x3]  ;;  %v2125_v59 = vld [vmem:[%s1993_s13 + $0x60] sm:$0xff] }
  0x38   : > { %v316_v31 = vrot.slane %v2039_v25, 1  ;;  %v317_v32 = vrot.slane %v2043_v27, 1  ;;  %v357_v39 = vrot.slane %v2039_v25, 2  ;;  %v358_v40 = vrot.slane %v2043_v27, 2  ;;  %1488 = vmatpush3.msk.msra.mxu0 %vm987_vm2, %v937_v38  ;;  %1526 = vmatpush3.msk.msra.mxu1 %vm987_vm2, %v937_v38  ;;  %v2128_v60 = vld [vmem:[%s1993_s13 + $0x68] sm:$0xff]  ;;  %v2165_v17 = vld [vmem:[%s1993_s13 + $0x80] sm:$0xff] }
  0x39   : > { %v356_v26 = vsel %vm346_vm0, %v353_v20, %v355_v24  ;;  %v319_v41 = vrot.slane %v259_v37, 1  ;;  %v360_v44 = vrot.slane %v259_v37, 2  ;;  %v321_v48 = vrot.slane %v2090_v46, 1  ;;  %v265_v4 = vld [vmem:[%s1993_s13 + $0x70] sm:$0x3] }
  0x3a   : > { %v318_v35 = vsel %vm305_vm1, %v316_v31, %v317_v32  ;;  %v359_v42 = vsel %vm346_vm0, %v357_v39, %v358_v40  ;;  %v322_v49 = vrot.slane %v2093_v47, 1  ;;  %v362_v52 = vrot.slane %v2090_v46, 2 }
  0x3b   : > { %463 = vrot.lane.b32.xlu1 %v351_v13, %s2737_s30  ;;  %415 = vrot.lane.b32.xlu0 %v310_v14, %s2739_s15  ;;  %v320_v43 = vsel %vm305_vm1, %v317_v32, %v319_v41  ;;  %v361_v45 = vsel %vm346_vm0, %v358_v40, %v360_v44  ;;  %v363_v53 = vrot.slane %v2093_v47, 2  ;;  %v324_v54 = vrot.slane %v262_v51, 1  ;;  %v2162_v14 = vld [vmem:[%s1993_s13 + $0x78] sm:$0xff] }
  0x3c   : > { %v323_v50 = vsel %vm305_vm1, %v321_v48, %v322_v49  ;;  %v365_v57 = vrot.slane %v262_v51, 2  ;;  %v326_v61 = vrot.slane %v2125_v59, 1  ;;  %v327_v62 = vrot.slane %v2128_v60, 1 }
  0x3d   : > { %v364_v55 = vsel %vm346_vm0, %v362_v52, %v363_v53  ;;  %v325_v56 = vsel %vm305_vm1, %v322_v49, %v324_v54  ;;  %v367_v5 = vrot.slane %v2125_v59, 2  ;;  %v368_v6 = vrot.slane %v2128_v60, 2  ;;  %v2212_v49 = vld [vmem:[%s1993_s13 + $0x90] sm:$0xff]  ;;  %v2220_v52 = vld [vmem:[%s1993_s13 + $0x98] sm:$0xff] }
  0x3e   : > { %v366_v58 = vsel %vm346_vm0, %v363_v53, %v365_v57  ;;  %v328_v63 = vsel %vm305_vm1, %v326_v61, %v327_v62  ;;  %v329_v7 = vrot.slane %v265_v4, 1  ;;  %v370_v10 = vrot.slane %v265_v4, 2 }
  0x3f   : > { %417 = vrot.lane.b32.xlu1 %v313_v18, %s2739_s15  ;;  %557 = vrot.lane.b32.xlu0 %v313_v18, %s1826_s26  ;;  %v369_v8 = vsel %vm346_vm0, %v367_v5, %v368_v6  ;;  %v331_v18 = vrot.slane %v2162_v14, 1  ;;  %v332_v19 = vrot.slane %v2165_v17, 1  ;;  %v372_v28 = vrot.slane %v2162_v14, 2 }
  0x40   : > { %v330_v9 = vsel %vm305_vm1, %v327_v62, %v329_v7  ;;  %v371_v11 = vsel %vm346_vm0, %v368_v6, %v370_v10  ;;  %v373_v29 = vrot.slane %v2165_v17, 2  ;;  %v336_v57 = vrot.slane %v2212_v49, 1 }
  0x42   : > { %v374_v33 = vsel %vm346_vm0, %v372_v28, %v373_v29 }
  0x43   : > { %605 = vrot.lane.b32.xlu1 %v354_v22, %s2735_s27  ;;  %559 = vrot.lane.b32.xlu0 %v315_v23, %s1826_s26 }
  0x47   : > { %465 = vrot.lane.b32.xlu1 %v354_v22, %s2737_s30  ;;  %419 = vrot.lane.b32.xlu0 %v315_v23, %s2739_s15  ;;  %s2755_s15 = smov 4   ;;  %v333_v22 = vsel %vm305_vm1, %v331_v18, %v332_v19 }
  0x4b   : > { %653 = vrot.lane.b32.xlu1 %v2039_v25, %s1828_s9  ;;  %607 = vrot.lane.b32.xlu0 %v356_v26, %s2735_s27  ;;  %s1829_s27 = smov 28  }
  0x4f   : > { %513 = vrot.lane.b32.xlu1 %v2039_v25, %s1823_s14  ;;  %467 = vrot.lane.b32.xlu0 %v356_v26, %s2737_s30  ;;  %s1830_s30 = smov 32   ;;  %v268_v26 = vld [vmem:[%s1993_s13 + $0x88] sm:$0x3] }
  0x50   : > { %v334_v30 = vrot.slane %v268_v26, 1  ;;  %v375_v37 = vrot.slane %v268_v26, 2 }
  0x52   : > { %v335_v34 = vsel %vm305_vm1, %v332_v19, %v334_v30  ;;  %v376_v40 = vsel %vm346_vm0, %v373_v29, %v375_v37 }
  0x53   : > { %701 = vrot.lane.b32.xlu1 %v318_v35, %s1829_s27  ;;  %655 = vrot.lane.b32.xlu0 %v2043_v27, %s1828_s9 }
  0x57   : > { %561 = vrot.lane.b32.xlu1 %v318_v35, %s1826_s26  ;;  %515 = vrot.lane.b32.xlu0 %v2043_v27, %s1823_s14 }
  0x5b   : > { %749 = vrot.lane.b32.xlu1 %v359_v42, %s1830_s30  ;;  %703 = vrot.lane.b32.xlu0 %v320_v43, %s1829_s27 }
  0x5f   : > { %563 = vrot.lane.b32.xlu1 %v320_v43, %s1826_s26  ;;  %421 = vrot.lane.b32.xlu0 %v318_v35, %s2755_s15 }
  0x63   : > { %751 = vrot.lane.b32.xlu1 %v361_v45, %s1830_s30  ;;  %609 = vrot.lane.b32.xlu0 %v359_v42, %s2756_s5 }
  0x67   : > { %469 = vrot.lane.b32.xlu1 %v359_v42, %s2757_s6  ;;  %423 = vrot.lane.b32.xlu0 %v320_v43, %s2755_s15 }
  0x6b   : > { %657 = vrot.lane.b32.xlu1 %v2090_v46, %s1828_s9  ;;  %611 = vrot.lane.b32.xlu0 %v361_v45, %s2756_s5 }
  0x6f   : > { %517 = vrot.lane.b32.xlu1 %v2090_v46, %s1823_s14  ;;  %471 = vrot.lane.b32.xlu0 %v361_v45, %s2757_s6 }
  0x73   : > { %705 = vrot.lane.b32.xlu1 %v323_v50, %s1829_s27  ;;  %659 = vrot.lane.b32.xlu0 %v2093_v47, %s1828_s9 }
  0x77   : > { %565 = vrot.lane.b32.xlu1 %v323_v50, %s1826_s26  ;;  %519 = vrot.lane.b32.xlu0 %v2093_v47, %s1823_s14 }
  0x7b   : > { %753 = vrot.lane.b32.xlu1 %v364_v55, %s1830_s30  ;;  %707 = vrot.lane.b32.xlu0 %v325_v56, %s1829_s27 }
  0x7f   : > { %567 = vrot.lane.b32.xlu1 %v325_v56, %s1826_s26  ;;  %425 = vrot.lane.b32.xlu0 %v323_v50, %s2755_s15 }
  0x83   : > { %755 = vrot.lane.b32.xlu1 %v366_v58, %s1830_s30  ;;  %613 = vrot.lane.b32.xlu0 %v364_v55, %s2756_s5 }
  0x87   : > { %473 = vrot.lane.b32.xlu1 %v364_v55, %s2757_s6  ;;  %427 = vrot.lane.b32.xlu0 %v325_v56, %s2755_s15 }
  0x8b   : > { %661 = vrot.lane.b32.xlu1 %v2125_v59, %s1828_s9  ;;  %615 = vrot.lane.b32.xlu0 %v366_v58, %s2756_s5 }
  0x8f   : > { %521 = vrot.lane.b32.xlu1 %v2125_v59, %s1823_s14  ;;  %475 = vrot.lane.b32.xlu0 %v366_v58, %s2757_s6  ;;  %v337_v58 = vrot.slane %v2220_v52, 1 }
  0x91   : > { %v338_v5 = vsel %vm305_vm1, %v336_v57, %v337_v58 }
  0x93   : > { %709 = vrot.lane.b32.xlu1 %v328_v63, %s1829_s27  ;;  %663 = vrot.lane.b32.xlu0 %v2128_v60, %s1828_s9 }
  0x97   : > { %569 = vrot.lane.b32.xlu1 %v328_v63, %s1826_s26  ;;  %523 = vrot.lane.b32.xlu0 %v2128_v60, %s1823_s14 }
  0x9b   : > { %757 = vrot.lane.b32.xlu1 %v369_v8, %s1830_s30  ;;  %711 = vrot.lane.b32.xlu0 %v330_v9, %s1829_s27 }
  0x9f   : > { %571 = vrot.lane.b32.xlu1 %v330_v9, %s1826_s26  ;;  %429 = vrot.lane.b32.xlu0 %v328_v63, %s2755_s15 }
  0xa3   : > { %759 = vrot.lane.b32.xlu1 %v371_v11, %s1830_s30  ;;  %617 = vrot.lane.b32.xlu0 %v369_v8, %s2756_s5 }
  0xa5   : > { %v2157_v12 = vpop.permute.xlu1 %511  ;;  %v510_v13 = vpop.permute.xlu0 %509 }
  0xa7   : > { %477 = vrot.lane.b32.xlu1 %v369_v8, %s2757_s6  ;;  %431 = vrot.lane.b32.xlu0 %v330_v9, %s2755_s15  ;;  %v271_v9 = vld [vmem:[%s1993_s13 + $0xa0] sm:$0x3] }
  0xa8   : > { %v380_v29 = vrot.slane %v271_v9, 2 }
  0xa9   : > { %v462_v15 = vpop.permute.xlu1 %461  ;;  %v414_v16 = vpop.permute.xlu0 %413 }
  0xaa   : > { %v798_v43 = vsel %vm797_vm3, %v2002_v2, %v414_v16  ;;  %v339_v16 = vrot.slane %v271_v9, 1 }
  0xab   : > { %665 = vrot.lane.b32.xlu1 %v2162_v14, %s1828_s9  ;;  %619 = vrot.lane.b32.xlu0 %v371_v11, %s2756_s5  ;;  %v815_v48 = vsel %vm814_vm4, %v798_v43, %v462_v15  ;;  %v377_v15 = vrot.slane %v2212_v49, 2  ;;  %v2287_v43 = vld [vmem:[%s1993_s13 + $0xa8] sm:$0xff] }
  0xac   : > { %v832_v2 = vsel %vm831_vm5, %v815_v48, %v510_v13 }
  0xad   : > { %v2172_v20 = vpop.permute.xlu1 %463  ;;  %v416_v21 = vpop.permute.xlu0 %415 }
  0xae   : > { %v799_v54 = vsel %vm797_vm3, %v2009_v3, %v416_v21 }
  0xaf   : > { %525 = vrot.lane.b32.xlu1 %v2162_v14, %s1823_s14  ;;  %479 = vrot.lane.b32.xlu0 %v371_v11, %s2757_s6  ;;  %v816_v3 = vsel %vm814_vm4, %v799_v54, %v2172_v20 }
  0xb0   : > { %v833_v6 = vsel %vm831_vm5, %v816_v3, %v2157_v12  ;;  %v378_v12 = vrot.slane %v2220_v52, 2 }
  0xb1   : > { %v2178_v23 = vpop.permute.xlu1 %417  ;;  %v558_v24 = vpop.permute.xlu0 %557 }
  0xb2   : > { %v849_v53 = vsel %vm848_vm6, %v832_v2, %v558_v24  ;;  %v340_v24 = vsel %vm305_vm1, %v337_v58, %v339_v16  ;;  %v2296_v2 = vld [vmem:[%s1993_s13 + $0xb0] sm:$0xff] }
  0xb3   : > { %713 = vrot.lane.b32.xlu1 %v333_v22, %s1829_s27  ;;  %667 = vrot.lane.b32.xlu0 %v2165_v17, %s1828_s9 }
  0xb5   : > { %v606_v31 = vpop.permute.xlu1 %605  ;;  %v560_v32 = vpop.permute.xlu0 %559 }
  0xb6   : > { %v866_v55 = vsel %vm865_vm7, %v849_v53, %v606_v31  ;;  %v850_v10 = vsel %vm848_vm6, %v833_v6, %v560_v32  ;;  %v381_v32 = vsel %vm346_vm0, %v378_v12, %v380_v29  ;;  %v342_v53 = vrot.slane %v2296_v2, 1 }
  0xb7   : > { %573 = vrot.lane.b32.xlu1 %v333_v22, %s1826_s26  ;;  %527 = vrot.lane.b32.xlu0 %v2165_v17, %s1823_s14 }
  0xb9   : > { %v2191_v35 = vpop.permute.xlu1 %465  ;;  %v2193_v36 = vpop.permute.xlu0 %419 }
  0xba   : > { %v801_v57 = vsel %vm797_vm3, %v1996_v0, %v2193_v36  ;;  %v274_v0 = vld [vmem:[%s1993_s13 + $0xb8] sm:$0x3] }
  0xbb   : > { %761 = vrot.lane.b32.xlu1 %v374_v33, %s1830_s30  ;;  %715 = vrot.lane.b32.xlu0 %v335_v34, %s1829_s27  ;;  %v344_v6 = vrot.slane %v274_v0, 1 }
  0xbd   : > { %v654_v38 = vpop.permute.xlu1 %653  ;;  %v608_v39 = vpop.permute.xlu0 %607 }
  0xbe   : > { %v883_v56 = vsel %vm882_vm8, %v866_v55, %v654_v38  ;;  %v867_v11 = vsel %vm865_vm7, %v850_v10, %v608_v39  ;;  %v800_v39 = vsel %vm797_vm3, %v1999_v1, %v2178_v23 }
  0xbf   : > { %575 = vrot.lane.b32.xlu1 %v335_v34, %s1826_s26  ;;  %433 = vrot.lane.b32.xlu0 %v333_v22, %s2755_s15  ;;  %v379_v22 = vsel %vm346_vm0, %v377_v15, %v378_v12  ;;  %v345_v15 = vsel %vm305_vm1, %v342_v53, %v344_v6 }
  0xc1   : > { %v2200_v41 = vpop.permute.xlu1 %513  ;;  %v2202_v42 = vpop.permute.xlu0 %467 }
  0xc2   : > { %v818_v58 = vsel %vm814_vm4, %v801_v57, %v2202_v42 }
  0xc3   : > { %763 = vrot.lane.b32.xlu1 %v376_v40, %s1830_s30  ;;  %621 = vrot.lane.b32.xlu0 %v374_v33, %s2756_s5 }
  0xc5   : > { %v702_v44 = vpop.permute.xlu1 %701  ;;  %v656_v45 = vpop.permute.xlu0 %655 }
  0xc6   : > { %v900_v61 = vsel %vm899_vm9, %v883_v56, %v702_v44  ;;  %v884_v13 = vsel %vm882_vm8, %v867_v11, %v656_v45 }
  0xc7   : > { %481 = vrot.lane.b32.xlu1 %v374_v33, %s2757_s6  ;;  %435 = vrot.lane.b32.xlu0 %v335_v34, %s2755_s15 }
  0xc9   : > { %v2215_v50 = vpop.permute.xlu1 %561  ;;  %v2217_v51 = vpop.permute.xlu0 %515 }
  0xcb   : > { %669 = vrot.lane.b32.xlu1 %v2212_v49, %s1828_s9  ;;  %623 = vrot.lane.b32.xlu0 %v376_v40, %s2756_s5 }
  0xcd   : > { %v750_v62 = vpop.permute.xlu1 %749  ;;  %v704_v63 = vpop.permute.xlu0 %703 }
  0xce   : > { %v917_v4 = vsel %vm916_vm10, %v900_v61, %v750_v62  ;;  %v901_v18 = vsel %vm899_vm9, %v884_v13, %v704_v63  ;;  %v835_v62 = vsel %vm831_vm5, %v818_v58, %v2217_v51  ;;  %v383_v51 = vrot.slane %v2296_v2, 2  ;;  %v277_v58 = vld [vmem:[%s1993_s13 + $0xd0] sm:$0x3] }
  0xcf   : > { %529 = vrot.lane.b32.xlu1 %v2212_v49, %s1823_s14  ;;  %483 = vrot.lane.b32.xlu0 %v376_v40, %s2757_s6  ;;  %v817_v40 = vsel %vm814_vm4, %v800_v39, %v2191_v35 }
  0xd0   : > { %1489 = vmatprep.mubr.msk.f32.mxu0 %vm938_vm11, %v917_v4  ;;  %v834_v44 = vsel %vm831_vm5, %v817_v40, %v2200_v41  ;;  %v341_v41 = vrot.slane %v2287_v43, 1 }
  0xd1   : > { %v2243_v7 = vpop.permute.xlu1 %563  ;;  %v2245_v8 = vpop.permute.xlu0 %421  ;;  %v851_v1 = vsel %vm848_vm6, %v834_v44, %v2215_v50  ;;  %v276_v44 = vld [vmem:[%s1993_s13 + $0xc8] sm:$0xff] }
  0xd2   : > { %v343_v61 = vsel %vm305_vm1, %v341_v41, %v342_v53  ;;  %v852_v36 = vsel %vm848_vm6, %v835_v62, %v2243_v7  ;;  %v396_v62 = vrot.slane %v276_v44, 2 }
  0xd3   : > { %717 = vrot.lane.b32.xlu1 %v338_v5, %s1829_s27  ;;  %671 = vrot.lane.b32.xlu0 %v2220_v52, %s1828_s9 }
  0xd5   : > { %v752_v19 = vpop.permute.xlu1 %751  ;;  %v610_v20 = vpop.permute.xlu0 %609 }
  0xd6   : > { %v918_v21 = vsel %vm916_vm10, %v901_v18, %v752_v19  ;;  %v868_v23 = vsel %vm865_vm7, %v851_v1, %v610_v20  ;;  %v385_v18 = vrot.slane %v274_v0, 2  ;;  %v393_v0 = vrot.slane %v277_v58, 1 }
  0xd7   : > { %577 = vrot.lane.b32.xlu1 %v338_v5, %s1826_s26  ;;  %531 = vrot.lane.b32.xlu0 %v2220_v52, %s1823_s14 }
  0xd8   : > { %1490 = vmatmul.mubr.msk.f32.vlgmr.msra.gmra.mrb[0].mxu0 %vm938_vm11, %v918_v21  ;;  %v386_v21 = vsel %vm346_vm0, %v383_v51, %v385_v18  ;;  %v279_v18 = vld [vmem:[%s1993_s13 + $0xe0] sm:$0xff] }
  0xd9   : > { %v2264_v26 = vpop.permute.xlu1 %469  ;;  %v2266_v28 = vpop.permute.xlu0 %423 }
  0xdb   : > { %765 = vrot.lane.b32.xlu1 %v379_v22, %s1830_s30  ;;  %719 = vrot.lane.b32.xlu0 %v340_v24, %s1829_s27 }
  0xdd   : > { %v658_v30 = vpop.permute.xlu1 %657  ;;  %v612_v31 = vpop.permute.xlu0 %611 }
  0xde   : > { %v885_v35 = vsel %vm882_vm8, %v868_v23, %v658_v30  ;;  %v869_v4 = vsel %vm865_vm7, %v852_v36, %v612_v31  ;;  %v802_v31 = vsel %vm797_vm3, %v2039_v25, %v2245_v8  ;;  %v391_v23 = vrot.slane %v276_v44, 1 }
  0xdf   : > { %579 = vrot.lane.b32.xlu1 %v340_v24, %s1826_s26  ;;  %437 = vrot.lane.b32.xlu0 %v338_v5, %s2755_s15  ;;  %v382_v5 = vrot.slane %v2287_v43, 2 }
  0xe1   : > { %v2273_v33 = vpop.permute.xlu1 %517  ;;  %v2275_v34 = vpop.permute.xlu0 %471  ;;  %v384_v13 = vsel %vm346_vm0, %v382_v5, %v383_v51  ;;  %v394_v5 = vsel %vm305_vm1, %v391_v23, %v393_v0 }
  0xe3   : > { %767 = vrot.lane.b32.xlu1 %v381_v32, %s1830_s30  ;;  %625 = vrot.lane.b32.xlu0 %v379_v22, %s2756_s5 }
  0xe5   : > { %v706_v37 = vpop.permute.xlu1 %705  ;;  %v660_v38 = vpop.permute.xlu0 %659 }
  0xe6   : > { %v902_v54 = vsel %vm899_vm9, %v885_v35, %v706_v37  ;;  %v886_v42 = vsel %vm882_vm8, %v869_v4, %v660_v38  ;;  %v275_v37 = vld [vmem:[%s1993_s13 + $0xc0] sm:$0xff] }
  0xe7   : > { %485 = vrot.lane.b32.xlu1 %v379_v22, %s2757_s6  ;;  %439 = vrot.lane.b32.xlu0 %v340_v24, %s2755_s15 }
  0xe9   : > { %v2291_v45 = vpop.permute.xlu1 %565  ;;  %v2293_v48 = vpop.permute.xlu0 %519 }
  0xeb   : > { %673 = vrot.lane.b32.xlu1 %v2287_v43, %s1828_s9  ;;  %627 = vrot.lane.b32.xlu0 %v381_v32, %s2756_s5 }
  0xed   : > { %v754_v55 = vpop.permute.xlu1 %753  ;;  %v708_v56 = vpop.permute.xlu0 %707 }
  0xee   : > { %v919_v50 = vsel %vm916_vm10, %v902_v54, %v754_v55  ;;  %v903_v9 = vsel %vm899_vm9, %v886_v42, %v708_v56 }
  0xef   : > { %533 = vrot.lane.b32.xlu1 %v2287_v43, %s1823_s14  ;;  %487 = vrot.lane.b32.xlu0 %v381_v32, %s2757_s6  ;;  %v819_v32 = vsel %vm814_vm4, %v802_v31, %v2264_v26  ;;  %v390_v26 = vrot.slane %v275_v37, 1 }
  0xf0   : > { %1492 = vmatprep.mubr.msk.f32.mxu0 %vm938_vm11, %v919_v50  ;;  %v836_v38 = vsel %vm831_vm5, %v819_v32, %v2273_v33 }
  0xf1   : > { %v2321_v63 = vpop.permute.xlu1 %567  ;;  %v2323_v3 = vpop.permute.xlu0 %425  ;;  %v853_v1 = vsel %vm848_vm6, %v836_v38, %v2291_v45  ;;  %v803_v45 = vsel %vm797_vm3, %v2043_v27, %v2266_v28  ;;  %v392_v55 = vsel %vm305_vm1, %v390_v26, %v391_v23  ;;  %v409_v38 = vrot.slane %v279_v18, 2 }
  0xf2   : > { %v820_v54 = vsel %vm814_vm4, %v803_v45, %v2275_v34 }
  0xf3   : > { %721 = vrot.lane.b32.xlu1 %v343_v61, %s1829_s27  ;;  %675 = vrot.lane.b32.xlu0 %v2296_v2, %s1828_s9  ;;  %v837_v56 = vsel %vm831_vm5, %v820_v54, %v2293_v48 }
  0xf4   : > { %v854_v27 = vsel %vm848_vm6, %v837_v56, %v2321_v63 }
  0xf5   : > { %v756_v10 = vpop.permute.xlu1 %755  ;;  %v614_v11 = vpop.permute.xlu0 %613 }
  0xf6   : > { %v920_v7 = vsel %vm916_vm10, %v903_v9, %v756_v10  ;;  %v870_v25 = vsel %vm865_vm7, %v853_v1, %v614_v11  ;;  %v398_v9 = vrot.slane %v277_v58, 2 }
  0xf7   : > { %581 = vrot.lane.b32.xlu1 %v343_v61, %s1826_s26  ;;  %535 = vrot.lane.b32.xlu0 %v2296_v2, %s1823_s14 }
  0xf8   : > { %1493 = vmatmul.mubr.msk.f32.gmra.mrb[2].mxu0 %vm938_vm11, %v920_v7  ;;  %v399_v7 = vsel %vm346_vm0, %v396_v62, %v398_v9 }
  0xf9   : > { %v2343_v12 = vpop.permute.xlu1 %473  ;;  %v2345_v16 = vpop.permute.xlu0 %427 }
  0xfb   : > { %769 = vrot.lane.b32.xlu1 %v384_v13, %s1830_s30  ;;  %723 = vrot.lane.b32.xlu0 %v345_v15, %s1829_s27 }
  0xfd   : > { %v662_v19 = vpop.permute.xlu1 %661  ;;  %v616_v20 = vpop.permute.xlu0 %615 }
  0xfe   : > { %v887_v8 = vsel %vm882_vm8, %v870_v25, %v662_v19  ;;  %v871_v28 = vsel %vm865_vm7, %v854_v27, %v616_v20  ;;  %v278_v19 = vld [vmem:[%s1993_s13 + $0xd8] sm:$0xff]  ;;  %v280_v20 = vld [vmem:[%s1993_s13 + $0xe8] sm:$0x3]  ;;  %s222_s13 = sand.u32 1, %s1797_s19  }
  0xff   : > { %583 = vrot.lane.b32.xlu1 %v345_v15, %s1826_s26  ;;  %441 = vrot.lane.b32.xlu0 %v343_v61, %s2755_s15  ;;  %v395_v61 = vrot.slane %v275_v37, 2  ;;  %v411_v26 = vrot.slane %v280_v20, 2 }
 0x101   : > { %v2352_v22 = vpop.permute.xlu1 %521  ;;  %v2354_v24 = vpop.permute.xlu0 %475  ;;  %v397_v63 = vsel %vm346_vm0, %v395_v61, %v396_v62 }
 0x103   : > { %771 = vrot.lane.b32.xlu1 %v386_v21, %s1830_s30  ;;  %629 = vrot.lane.b32.xlu0 %v384_v13, %s2756_s5 }
 0x105   : > { %v710_v29 = vpop.permute.xlu1 %709  ;;  %v664_v30 = vpop.permute.xlu0 %663 }
 0x106   : > { %v904_v33 = vsel %vm899_vm9, %v887_v8, %v710_v29  ;;  %v888_v34 = vsel %vm882_vm8, %v871_v28, %v664_v30  ;;  %v403_v29 = vrot.slane %v278_v19, 1  ;;  %v406_v30 = vrot.slane %v280_v20, 1 }
 0x107   : > { %489 = vrot.lane.b32.xlu1 %v384_v13, %s2757_s6  ;;  %443 = vrot.lane.b32.xlu0 %v345_v15, %s2755_s15 }
 0x109   : > { %v2368_v39 = vpop.permute.xlu1 %569  ;;  %v2370_v40 = vpop.permute.xlu0 %523 }
 0x10b   : > { %677 = vrot.lane.b32.xlu1 %v275_v37, %s1828_s9  ;;  %631 = vrot.lane.b32.xlu0 %v386_v21, %s2756_s5 }
 0x10d   : > { %v758_v35 = vpop.permute.xlu1 %757  ;;  %v712_v41 = vpop.permute.xlu0 %711 }
 0x10e   : > { %v921_v53 = vsel %vm916_vm10, %v904_v33, %v758_v35  ;;  %v905_v48 = vsel %vm899_vm9, %v888_v34, %v712_v41  ;;  %v412_v41 = vsel %vm346_vm0, %v409_v38, %v411_v26 }
 0x10f   : > { %537 = vrot.lane.b32.xlu1 %v275_v37, %s1823_s14  ;;  %491 = vrot.lane.b32.xlu0 %v386_v21, %s2757_s6  ;;  %v404_v21 = vrot.slane %v279_v18, 1  ;;  %v804_v37 = vsel %vm797_vm3, %v2090_v46, %v2323_v3 }
 0x110   : > { %1495 = vmatprep.mubr.msk.f32.mxu0 %vm938_vm11, %v921_v53  ;;  %v821_v1 = vsel %vm814_vm4, %v804_v37, %v2343_v12 }
 0x111   : > { %v2392_v50 = vpop.permute.xlu1 %571  ;;  %v2394_v57 = vpop.permute.xlu0 %429  ;;  %v407_v25 = vsel %vm305_vm1, %v404_v21, %v406_v30  ;;  %v405_v8 = vsel %vm305_vm1, %v403_v29, %v404_v21  ;;  %v838_v23 = vsel %vm831_vm5, %v821_v1, %v2352_v22 }
 0x112   : > { %v855_v46 = vsel %vm848_vm6, %v838_v23, %v2368_v39  ;;  %v805_v39 = vsel %vm797_vm3, %v2093_v47, %v2345_v16  ;;  %v806_v9 = vsel %vm797_vm3, %v2125_v59, %v2394_v57 }
 0x113   : > { %725 = vrot.lane.b32.xlu1 %v392_v55, %s1829_s27  ;;  %679 = vrot.lane.b32.xlu0 %v276_v44, %s1828_s9  ;;  %v822_v56 = vsel %vm814_vm4, %v805_v39, %v2354_v24 }
 0x114   : > { %v839_v58 = vsel %vm831_vm5, %v822_v56, %v2370_v40 }
 0x115   : > { %v760_v36 = vpop.permute.xlu1 %759  ;;  %v618_v4 = vpop.permute.xlu0 %617  ;;  %v856_v34 = vsel %vm848_vm6, %v839_v58, %v2392_v50 }
 0x116   : > { %v922_v42 = vsel %vm916_vm10, %v905_v48, %v760_v36  ;;  %v872_v3 = vsel %vm865_vm7, %v855_v46, %v618_v4 }
 0x117   : > { %585 = vrot.lane.b32.xlu1 %v392_v55, %s1826_s26  ;;  %539 = vrot.lane.b32.xlu0 %v276_v44, %s1823_s14  ;;  %v408_v44 = vrot.slane %v278_v19, 2  ;;  %s1424_s14 = sshll.u32 %s222_s13, 7 }
 0x118   : > { %1496 = vmatmul.mubr.msk.f32.gmra.mrb[4].mxu0 %vm938_vm11, %v922_v42 }
 0x119   : > { %v2410_v51 = vpop.permute.xlu1 %477  ;;  %v2412_v6 = vpop.permute.xlu0 %431  ;;  %v410_v53 = vsel %vm346_vm0, %v408_v44, %v409_v38 }
 0x11a   : > { %v807_v59 = vsel %vm797_vm3, %v2128_v60, %v2412_v6 }
 0x11b   : > { %773 = vrot.lane.b32.xlu1 %v397_v63, %s1830_s30  ;;  %727 = vrot.lane.b32.xlu0 %v394_v5, %s1829_s27 }
 0x11d   : > { %v666_v10 = vpop.permute.xlu1 %665  ;;  %v620_v11 = vpop.permute.xlu0 %619 }
 0x11e   : > { %v889_v12 = vsel %vm882_vm8, %v872_v3, %v666_v10  ;;  %v873_v61 = vsel %vm865_vm7, %v856_v34, %v620_v11  ;;  %v823_v10 = vsel %vm814_vm4, %v806_v9, %v2410_v51 }
 0x11f   : > { %633 = vrot.lane.b32.xlu1 %v397_v63, %s2756_s5  ;;  %587 = vrot.lane.b32.xlu0 %v394_v5, %s1826_s26  ;;  %s2551_s26 = scalar_lea.vmem [#allocation2], %s1424_s14  ;;  %s1831_s14 = smov [#allocation2]  }
 0x120   : > { %s1238_s12 = sshll.u32 %s2551_s26, 4  ;;  %s2578_s12 = int_to_ptr.vmem [resolvable:$true] %s1238_s12 }
 0x121   : > { %v526_v13 = vpop.permute.xlu1 %525  ;;  %v2419_v15 = vpop.permute.xlu0 %479 }
 0x122   : > { %v840_v11 = vsel %vm831_vm5, %v823_v10, %v526_v13  ;;  %v824_v57 = vsel %vm814_vm4, %v807_v59, %v2419_v15 }
 0x123   : > { %635 = vrot.lane.b32.xlu1 %v399_v7, %s2756_s5  ;;  %775 = vrot.lane.b32.xlu0 %v399_v7, %s1830_s30 }
 0x125   : > { %v714_v31 = vpop.permute.xlu1 %713  ;;  %v668_v32 = vpop.permute.xlu0 %667 }
 0x126   : > { %v906_v45 = vsel %vm899_vm9, %v889_v12, %v714_v31  ;;  %v890_v47 = vsel %vm882_vm8, %v873_v61, %v668_v32 }
 0x127   : > { %683 = vrot.lane.b32.xlu1 %v279_v18, %s1828_s9  ;;  %681 = vrot.lane.b32.xlu0 %v278_v19, %s1828_s9 }
 0x129   : > { %v574_v33 = vpop.permute.xlu1 %573  ;;  %v528_v35 = vpop.permute.xlu0 %527 }
 0x12a   : > { %v857_v19 = vsel %vm848_vm6, %v840_v11, %v574_v33  ;;  %v841_v51 = vsel %vm831_vm5, %v824_v57, %v528_v35 }
 0x12b   : > { %731 = vrot.lane.b32.xlu1 %v407_v25, %s1829_s27  ;;  %729 = vrot.lane.b32.xlu0 %v405_v8, %s1829_s27  ;;  %s1448_s27 = sshll.u32 %s1809_s22, 1  ;;  %s1643_s22 = scalar_lea.vmem %s2578_s12, 2048 }
 0x12c   : > { %s2569_s9 = sadd.s32 %s1805_s21, %s1448_s27  ;;  %s2584_s21 = scalar_lea.sflag [#allocation3], %s222_s13 }
 0x12d   : > { %v762_v22 = vpop.permute.xlu1 %761  ;;  %v716_v54 = vpop.permute.xlu0 %715  ;;  %s1457_s7 = sshll.u32 %s2569_s9, 11  ;;  %p1644_p2 = scmp.ne.s32.totalorder %s2578_s12, %s1643_s22 }
 0x12e   : > { %v923_v55 = vsel %vm916_vm10, %v906_v45, %v762_v22  ;;  %v907_v16 = vsel %vm899_vm9, %v890_v47, %v716_v54  ;;  %s2576_s5 = scalar_lea.hbm %s2727_s2, %s1457_s7  ;;  %s1647_s27 = sshll.u32 %s1831_s14, 4  ;;  %s1648_s27 = int_to_ptr.vmem [resolvable:$false] %s1647_s27 }
 0x12f   : > { %779 = vrot.lane.b32.xlu1 %v412_v41, %s1830_s30  ;;  %777 = vrot.lane.b32.xlu0 %v410_v53, %s1830_s30  ;;  %p1645_p6 = pnand %p1644_p2, %p1937_p5  ;;  %s1649_s7 = scalar_lea.vmem %s1648_s27, 4096 }
 0x130   : > { %1498 = vmatprep.mubr.msk.f32.mxu0 %vm938_vm11, %v923_v55  ;;  %p1650_p10 = scmp.lt.s32.totalorder %s2578_s12, %s1648_s27  ;;  %p1651_p11 = scmp.lt.s32.totalorder %s1649_s7, %s1643_s22 }
 0x131   : > { %v576_v27 = vpop.permute.xlu1 %575  ;;  %v434_v28 = vpop.permute.xlu0 %433  ;;  %p1646_p9 = pneg %p1645_p6 }
 0x132   : > { %v858_v38 = vsel %vm848_vm6, %v841_v51, %v576_v27  ;;  %v808_v41 = vsel %vm797_vm3, %v2162_v14, %v434_v28  ;;  %p1652_p12 = por %p1651_p11, %p1650_p10 }
 0x134   : > { %p1653_p13 = pnand %p1652_p12, %p1646_p9 }
 0x135   : > { %v764_v62 = vpop.permute.xlu1 %763  ;;  %v622_v0 = vpop.permute.xlu0 %621 }
 0x136   : > { %v924_v24 = vsel %vm916_vm10, %v907_v16, %v764_v62  ;;  %v874_v20 = vsel %vm865_vm7, %v857_v19, %v622_v0 }
 0x137   : > { %1499 = vmatmul.mubr.msk.f32.gmra.mrb[6].mxu0 %vm938_vm11, %v924_v24 }
 0x139   : > { %v482_v48 = vpop.permute.xlu1 %481  ;;  %v436_v36 = vpop.permute.xlu0 %435 }
 0x13a   : > { %v825_v53 = vsel %vm814_vm4, %v808_v41, %v482_v48  ;;  %v809_v14 = vsel %vm797_vm3, %v2165_v17, %v436_v36 }
 0x13d   : > { %v670_v40 = vpop.permute.xlu1 %669  ;;  %v624_v4 = vpop.permute.xlu0 %623 }
 0x13e   : > { %v891_v21 = vsel %vm882_vm8, %v874_v20, %v670_v40  ;;  %v875_v44 = vsel %vm865_vm7, %v858_v38, %v624_v4 }
 0x141   : > { %v530_v42 = vpop.permute.xlu1 %529  ;;  %v484_v63 = vpop.permute.xlu0 %483 }
 0x142   : > { %v842_v45 = vsel %vm831_vm5, %v825_v53, %v530_v42  ;;  %v826_v28 = vsel %vm814_vm4, %v809_v14, %v484_v63 }
 0x145   : > { %v718_v5 = vpop.permute.xlu1 %717  ;;  %v672_v50 = vpop.permute.xlu0 %671 }
 0x146   : > { %v908_v29 = vsel %vm899_vm9, %v891_v21, %v718_v5  ;;  %v892_v1 = vsel %vm882_vm8, %v875_v44, %v672_v50 }
 0x149   : > { %v578_v7 = vpop.permute.xlu1 %577  ;;  %v532_v18 = vpop.permute.xlu0 %531 }
 0x14a   : > { %v859_v55 = vsel %vm848_vm6, %v842_v45, %v578_v7  ;;  %v843_v47 = vsel %vm831_vm5, %v826_v28, %v532_v18 }
 0x14d   : > { %v766_v30 = vpop.permute.xlu1 %765  ;;  %v720_v31 = vpop.permute.xlu0 %719 }
 0x14e   : > { %v925_v32 = vsel %vm916_vm10, %v908_v29, %v766_v30  ;;  %v909_v25 = vsel %vm899_vm9, %v892_v1, %v720_v31 }
 0x14f   : > { %1501 = vmatprep.mubr.msk.f32.mxu1 %vm938_vm11, %v925_v32 }
 0x151   : > { %v580_v13 = vpop.permute.xlu1 %579  ;;  %v438_v37 = vpop.permute.xlu0 %437 }
 0x152   : > { %v860_v0 = vsel %vm848_vm6, %v843_v47, %v580_v13  ;;  %v810_v18 = vsel %vm797_vm3, %v2212_v49, %v438_v37 }
 0x155   : > { %v768_v8 = vpop.permute.xlu1 %767  ;;  %v626_v26 = vpop.permute.xlu0 %625 }
 0x156   : > { %v926_v60 = vsel %vm916_vm10, %v909_v25, %v768_v8  ;;  %v876_v39 = vsel %vm865_vm7, %v859_v55, %v626_v26 }
 0x157   : > { %1502 = vmatmul.mubr.msk.f32.vlgmr.msra.gmra.mrb[0].mxu1 %vm938_vm11, %v926_v60 }
 0x159   : > { %v486_v6 = vpop.permute.xlu1 %485  ;;  %v440_v15 = vpop.permute.xlu0 %439 }
 0x15a   : > { %v827_v19 = vsel %vm814_vm4, %v810_v18, %v486_v6  ;;  %v811_v49 = vsel %vm797_vm3, %v2220_v52, %v440_v15 }
 0x15d   : > { %v674_v23 = vpop.permute.xlu1 %673  ;;  %v628_v33 = vpop.permute.xlu0 %627 }
 0x15e   : > { %v893_v56 = vsel %vm882_vm8, %v876_v39, %v674_v23  ;;  %v877_v24 = vsel %vm865_vm7, %v860_v0, %v628_v33 }
 0x161   : > { %v534_v35 = vpop.permute.xlu1 %533  ;;  %v488_v46 = vpop.permute.xlu0 %487 }
 0x162   : > { %v844_v20 = vsel %vm831_vm5, %v827_v19, %v534_v35  ;;  %v828_v37 = vsel %vm814_vm4, %v811_v49, %v488_v46 }
 0x165   : > { %v722_v3 = vpop.permute.xlu1 %721  ;;  %v676_v12 = vpop.permute.xlu0 %675 }
 0x166   : > { %v910_v58 = vsel %vm899_vm9, %v893_v56, %v722_v3  ;;  %v894_v48 = vsel %vm882_vm8, %v877_v24, %v676_v12 }
 0x169   : > { %v582_v22 = vpop.permute.xlu1 %581  ;;  %v536_v54 = vpop.permute.xlu0 %535 }
 0x16a   : > { %v861_v30 = vsel %vm848_vm6, %v844_v20, %v582_v22  ;;  %v845_v38 = vsel %vm831_vm5, %v828_v37, %v536_v54 }
 0x16d   : > { %v770_v27 = vpop.permute.xlu1 %769  ;;  %v724_v34 = vpop.permute.xlu0 %723 }
 0x16e   : > { %v927_v61 = vsel %vm916_vm10, %v910_v58, %v770_v27  ;;  %v911_v40 = vsel %vm899_vm9, %v894_v48, %v724_v34 }
 0x16f   : > { %1504 = vmatprep.mubr.msk.f32.mxu1 %vm938_vm11, %v927_v61 }
 0x171   : > { %v584_v16 = vpop.permute.xlu1 %583  ;;  %v442_v62 = vpop.permute.xlu0 %441 }
 0x172   : > { %v862_v25 = vsel %vm848_vm6, %v845_v38, %v584_v16  ;;  %v812_v35 = vsel %vm797_vm3, %v2287_v43, %v442_v62 }
 0x175   : > { %v772_v4 = vpop.permute.xlu1 %771  ;;  %v630_v42 = vpop.permute.xlu0 %629 }
 0x176   : > { %v928_v17 = vsel %vm916_vm10, %v911_v40, %v772_v4  ;;  %v878_v31 = vsel %vm865_vm7, %v861_v30, %v630_v42 }
 0x177   : > { %1505 = vmatmul.mubr.msk.f32.gmra.mrb[2].mxu1 %vm938_vm11, %v928_v17 }
 0x179   : > { %v490_v36 = vpop.permute.xlu1 %489  ;;  %v444_v63 = vpop.permute.xlu0 %443 }
 0x17a   : > { %v813_v46 = vsel %vm797_vm3, %v2296_v2, %v444_v63  ;;  %v829_v3 = vsel %vm814_vm4, %v812_v35, %v490_v36 }
 0x17d   : > { %v678_v5 = vpop.permute.xlu1 %677  ;;  %v632_v50 = vpop.permute.xlu0 %631 }
 0x17e   : > { %v895_v32 = vsel %vm882_vm8, %v878_v31, %v678_v5  ;;  %v879_v8 = vsel %vm865_vm7, %v862_v25, %v632_v50 }
 0x181   : > { %v538_v9 = vpop.permute.xlu1 %537  ;;  %v492_v10 = vpop.permute.xlu0 %491 }
 0x182   : > { %v830_v12 = vsel %vm814_vm4, %v813_v46, %v492_v10  ;;  %v846_v41 = vsel %vm831_vm5, %v829_v3, %v538_v9 }
 0x185   : > { %v726_v11 = vpop.permute.xlu1 %725  ;;  %v680_v7 = vpop.permute.xlu0 %679 }
 0x186   : > { %v912_v59 = vsel %vm899_vm9, %v895_v32, %v726_v11  ;;  %v896_v26 = vsel %vm882_vm8, %v879_v8, %v680_v7 }
 0x189   : > { %v586_v21 = vpop.permute.xlu1 %585  ;;  %v540_v29 = vpop.permute.xlu0 %539 }
 0x18a   : > { %v847_v53 = vsel %vm831_vm5, %v830_v12, %v540_v29  ;;  %v863_v54 = vsel %vm848_vm6, %v846_v41, %v586_v21 }
 0x18d   : > { %v774_v57 = vpop.permute.xlu1 %773  ;;  %v728_v51 = vpop.permute.xlu0 %727 }
 0x18e   : > { %v929_v13 = vsel %vm916_vm10, %v912_v59, %v774_v57  ;;  %v913_v60 = vsel %vm899_vm9, %v896_v26, %v728_v51 }
 0x18f   : > { %1507 = vmatprep.mubr.msk.f32.mxu1 %vm938_vm11, %v929_v13 }
 0x191   : > { %v634_v44 = vpop.permute.xlu1 %633  ;;  %v588_v1 = vpop.permute.xlu0 %587 }
 0x192   : > { %v864_v55 = vsel %vm848_vm6, %v847_v53, %v588_v1  ;;  %v880_v43 = vsel %vm865_vm7, %v863_v54, %v634_v44 }
 0x195   : > { %v636_v6 = vpop.permute.xlu1 %635  ;;  %v776_v23 = vpop.permute.xlu0 %775 }
 0x196   : > { %v930_v52 = vsel %vm916_vm10, %v913_v60, %v776_v23  ;;  %v881_v2 = vsel %vm865_vm7, %v864_v55, %v636_v6 }
 0x197   : > { %1508 = vmatmul.mubr.msk.f32.gmra.mrb[4].mxu1 %vm938_vm11, %v930_v52 }
 0x199   : > { %v684_v15 = vpop.permute.xlu1 %683  ;;  %v682_v33 = vpop.permute.xlu0 %681 }
 0x19a   : > { %v898_v39 = vsel %vm882_vm8, %v881_v2, %v684_v15  ;;  %v897_v56 = vsel %vm882_vm8, %v880_v43, %v682_v33 }
 0x19d   : > { %v732_v45 = vpop.permute.xlu1 %731  ;;  %v730_v22 = vpop.permute.xlu0 %729 }
 0x19e   : > { %v915_v58 = vsel %vm899_vm9, %v898_v39, %v732_v45  ;;  %v914_v27 = vsel %vm899_vm9, %v897_v56, %v730_v22 }
 0x1a1   : > { %v780_v34 = vpop.permute.xlu1 %779  ;;  %v778_v61 = vpop.permute.xlu0 %777 }
 0x1a2   : > { %v932_v14 = vsel %vm916_vm10, %v915_v58, %v780_v34  ;;  %v931_v28 = vsel %vm916_vm10, %v914_v27, %v778_v61 }
 0x1a3   : > { %1510 = vmatprep.mubr.msk.f32.mxu1 %vm938_vm11, %v931_v28 }
 0x1a4   : > { %1511 = vmatmul.mubr.msk.f32.gmra.mrb[6].mxu1 %vm938_vm11, %v932_v14 }
 0x1ab   : > { %v1491_v47 = vpop.f32.mrb[0].mxu0 }
 0x1ac   : > { %1137 = vst [vmem:[%s2551_s26 + $0x8] sm:$0xff] %v1491_v47  ;;  %v1174_v16 = vmul.f32 %v1491_v47, %v1491_v47  ;;  %v1057_v62 = vpop.f32.mrb[1].mxu0 }
 0x1ad   : > { %1136 = vst [vmem:[%s2551_s26] sm:$0xff] %v1057_v62  ;;  %v1152_v0 = vadd.f32 %v1491_v47, %v1057_v62  ;;  %v1173_v24 = vmul.f32 %v1057_v62, %v1057_v62 }
 0x1af   : > { %v1189_v48 = vadd.f32 %v1174_v16, %v1173_v24 }
 0x1cb   : > { %v1494_v40 = vpop.f32.mrb[2].mxu0 }
 0x1cc   : > { %1139 = vst [vmem:[%s2551_s26 + $0x18] sm:$0xff] %v1494_v40  ;;  %v1067_v4 = vpop.f32.mrb[3].mxu0  ;;  %v1176_v36 = vmul.f32 %v1494_v40, %v1494_v40 }
 0x1cd   : > { %1138 = vst [vmem:[%s2551_s26 + $0x10] sm:$0xff] %v1067_v4  ;;  %v1153_v42 = vadd.f32 %v1152_v0, %v1067_v4  ;;  %v1175_v17 = vmul.f32 %v1067_v4, %v1067_v4 }
 0x1cf   : > { %v1190_v63 = vadd.f32 %v1189_v48, %v1175_v17  ;;  %v1154_v5 = vadd.f32 %v1494_v40, %v1153_v42 }
 0x1d1   : > { %v1191_v50 = vadd.f32 %v1190_v63, %v1176_v36 }
 0x1eb   : > { %v1497_v9 = vpop.f32.mrb[4].mxu0 }
 0x1ec   : > { %1141 = vst [vmem:[%s2551_s26 + $0x28] sm:$0xff] %v1497_v9  ;;  %v1077_v10 = vpop.f32.mrb[5].mxu0  ;;  %v1178_v18 = vmul.f32 %v1497_v9, %v1497_v9 }
 0x1ed   : > { %1140 = vst [vmem:[%s2551_s26 + $0x20] sm:$0xff] %v1077_v10  ;;  %v1155_v11 = vadd.f32 %v1154_v5, %v1077_v10  ;;  %v1177_v7 = vmul.f32 %v1077_v10, %v1077_v10 }
 0x1ef   : > { %v1192_v19 = vadd.f32 %v1191_v50, %v1177_v7  ;;  %v1156_v20 = vadd.f32 %v1497_v9, %v1155_v11 }
 0x1f1   : > { %v1193_v21 = vadd.f32 %v1192_v19, %v1178_v18 }
 0x20a   : > { %v1500_v29 = vpop.f32.mrb[6].mxu0 }
 0x20b   : > { %1143 = vst [vmem:[%s2551_s26 + $0x38] sm:$0xff] %v1500_v29  ;;  %v1087_v30 = vpop.f32.mrb[7].mxu0  ;;  %v1180_v59 = vmul.f32 %v1500_v29, %v1500_v29 }
 0x20c   : > { %1142 = vst [vmem:[%s2551_s26 + $0x30] sm:$0xff] %v1087_v30  ;;  %v1157_v31 = vadd.f32 %v1156_v20, %v1087_v30  ;;  %v1179_v32 = vmul.f32 %v1087_v30, %v1087_v30 }
 0x20e   : > { %v1158_v57 = vadd.f32 %v1500_v29, %v1157_v31  ;;  %v1194_v51 = vadd.f32 %v1193_v21, %v1179_v32 }
 0x210   : > { %v1195_v13 = vadd.f32 %v1194_v51, %v1180_v59 }
 0x22a   : > { %v1503_v49 = vpop.f32.mrb[0].mxu1 }
 0x22b   : > { %1145 = vst [vmem:[%s2551_s26 + $0x48] sm:$0xff] %v1503_v49  ;;  %v1097_v37 = vpop.f32.mrb[1].mxu1  ;;  %v1182_v1 = vmul.f32 %v1503_v49, %v1503_v49 }
 0x22c   : > { %1144 = vst [vmem:[%s2551_s26 + $0x40] sm:$0xff] %v1097_v37  ;;  %v1159_v38 = vadd.f32 %v1158_v57, %v1097_v37  ;;  %v1181_v44 = vmul.f32 %v1097_v37, %v1097_v37 }
 0x22e   : > { %v1196_v25 = vadd.f32 %v1195_v13, %v1181_v44  ;;  %v1160_v8 = vadd.f32 %v1503_v49, %v1159_v38 }
 0x230   : > { %v1197_v26 = vadd.f32 %v1196_v25, %v1182_v1 }
 0x24a   : > { %v1506_v60 = vpop.f32.mrb[2].mxu1 }
 0x24b   : > { %1147 = vst [vmem:[%s2551_s26 + $0x58] sm:$0xff] %v1506_v60  ;;  %v1107_v6 = vpop.f32.mrb[3].mxu1  ;;  %v1184_v15 = vmul.f32 %v1506_v60, %v1506_v60 }
 0x24c   : > { %1146 = vst [vmem:[%s2551_s26 + $0x50] sm:$0xff] %v1107_v6  ;;  %v1161_v23 = vadd.f32 %v1160_v8, %v1107_v6  ;;  %v1183_v52 = vmul.f32 %v1107_v6, %v1107_v6 }
 0x24e   : > { %v1198_v33 = vadd.f32 %v1197_v26, %v1183_v52  ;;  %v1162_v35 = vadd.f32 %v1506_v60, %v1161_v23 }
 0x250   : > { %v1199_v46 = vadd.f32 %v1198_v33, %v1184_v15 }
 0x26a   : > { %v1509_v3 = vpop.f32.mrb[4].mxu1 }
 0x26b   : > { %1149 = vst [vmem:[%s2551_s26 + $0x68] sm:$0xff] %v1509_v3  ;;  %v1117_v12 = vpop.f32.mrb[5].mxu1  ;;  %v1186_v45 = vmul.f32 %v1509_v3, %v1509_v3 }
 0x26c   : > { %1148 = vst [vmem:[%s2551_s26 + $0x60] sm:$0xff] %v1117_v12  ;;  %v1163_v41 = vadd.f32 %v1162_v35, %v1117_v12  ;;  %v1185_v53 = vmul.f32 %v1117_v12, %v1117_v12 }
 0x26e   : > { %v1200_v22 = vadd.f32 %v1199_v46, %v1185_v53  ;;  %v1164_v54 = vadd.f32 %v1509_v3, %v1163_v41 }
 0x270   : > { %v1201_v55 = vadd.f32 %v1200_v22, %v1186_v45 }
 0x277   : > { %v1512_v43 = vpop.f32.mrb[6].mxu1 }
 0x278   : > { %1151 = vst [vmem:[%s2551_s26 + $0x78] sm:$0xff] %v1512_v43  ;;  %v1127_v2 = vpop.f32.mrb[7].mxu1 }
 0x279   : > { %1150 = vst [vmem:[%s2551_s26 + $0x70] sm:$0xff] %v1127_v2  ;;  %v1165_v39 = vadd.f32 %v1164_v54, %v1127_v2  ;;  %v1187_v56 = vmul.f32 %v1127_v2, %v1127_v2 }
 0x27a   : > { %1656 = shalt.err (!%p1653_p13)
}
 0x27b   : > { %s1657_s13 = scalar_lea.hbm %s2576_s5, 2048  ;;  %s1661_s15 = scalar_lea.hbm %s2727_s2, 8192 }
 0x27c   : > { %p1658_p3 = scmp.ne.s32.totalorder %s2576_s5, %s1657_s13  ;;  %p1662_p2 = scmp.lt.u32.totalorder %s2576_s5, %s2727_s2 }
 0x27d   : > { %p1663_p6 = scmp.lt.u32.totalorder %s1661_s15, %s1657_s13  ;;  %p1665_p10 = scmp.lt.u32.totalorder %s1657_s13, %s2576_s5 }
 0x27e   : > { %p1659_p4 = pnand %p1658_p3, %p1937_p5 }
 0x27f   : > { %p1664_p9 = por %p1663_p6, %p1662_p2 }
 0x280   : > { %p1660_p8 = pneg %p1659_p4 }
 0x281   : > { %p1666_p11 = por %p1665_p10, %p1664_p9 }
 0x283   : > { %p1667_p12 = pnand %p1666_p11, %p1660_p8 }
 0x285   : > { %1670 = shalt.err (!%p1667_p12)
}
 0x286   : > { %s1832_s22 = smov 128   ;;  %v1188_v58 = vmul.f32 %v1512_v43, %v1512_v43  ;;  %v1166_v27 = vadd.f32 %v1512_v43, %v1165_v39  ;;  %v1202_v34 = vadd.f32 %v1201_v55, %v1187_v56  ;;  %s229_s7 = sand.u32 1, %s1785_s16  }
 0x287   : > { %1529 = dma.vmem_to_hbm [thread:$0]  (%p1937_p5), %s2578_s12, 2048, %s2576_s5, %s2584_s21, %s1832_s22, %s1832_s22, %s2757_s6  }
 0x288   : > { %v1167_v61 = vrot.slane %v1166_v27, 4  ;;  %v1203_v14 = vadd.f32 %v1202_v34, %v1188_v58  ;;  %s2610_s13 = sshll.u32 %s229_s7, 3  ;;  %s2758_s8 = sadd.s32 4294967295, %s1821_s25  }
 0x289   : > { %s2614_s26 = sand.u32 1, %s2758_s8   ;;  %s1452_s6 = sshll.u32 %s2569_s9, 7 }
 0x28a   : > { %v1168_v28 = vadd.f32 %v1167_v61, %v1166_v27  ;;  %v1204_v47 = vrot.slane %v1203_v14, 4  ;;  %s231_s12 = scalar_lea.vmem [#allocation4], %s2610_s13  ;;  %s2741_s21 = scalar_lea.vmem [#allocation6], %s2610_s13 }
 0x28b   : > { %s1256_s5 = sshll.u32 %s231_s12, 4  ;;  %s1271_s30 = sshll.u32 %s2741_s21, 4  ;;  %s2626_s5 = int_to_ptr.vmem [resolvable:$true] %s1256_s5  ;;  %s2633_s30 = int_to_ptr.vmem [resolvable:$true] %s1271_s30 }
 0x28c   : > { %v1169_v16 = vrot.slane %v1168_v28, 2  ;;  %v1205_v62 = vadd.f32 %v1204_v47, %v1203_v14  ;;  %s2624_s27 = scalar_lea.hbm %s2728_s3, %s1452_s6  ;;  %s2759_s7 = sld [smem:[#allocation13_spill]] }
 0x28d   : > { %s1218_s21 = scalar_lea.sflag [#allocation5], %s2614_s26  ;;  %s1671_s0 = scalar_lea.vmem %s2626_s5, 128 }
 0x28e   : > { %v1206_v0 = vrot.slane %v1205_v62, 2  ;;  %v1170_v24 = vadd.f32 %v1169_v16, %v1168_v28  ;;  %p1672_p5 = scmp.ne.s32.totalorder %s2626_s5, %s1671_s0  ;;  %s1833_s15 = smov [#allocation4]  }
 0x28f   : > { %s1675_s14 = sshll.u32 %s1833_s15, 4  ;;  %s1676_s14 = int_to_ptr.vmem [resolvable:$false] %s1675_s14 }
 0x290   : > { %v1171_v48 = vrot.slane %v1170_v24, 1  ;;  %v1207_v40 = vadd.f32 %v1206_v0, %v1205_v62  ;;  %p1673_p13 = pnand %p1672_p5, %p1976_p0  ;;  %s1677_s1 = scalar_lea.vmem %s1676_s14, 256 }
 0x291   : > { %p1678_p4 = scmp.lt.s32.totalorder %s2626_s5, %s1676_s14  ;;  %p1679_p8 = scmp.lt.s32.totalorder %s1677_s1, %s1671_s0 }
 0x292   : > { %v1172_v4 = vadd.f32 %v1171_v48, %v1170_v24  ;;  %v1208_v42 = vrot.slane %v1207_v40, 1  ;;  %s2631_s8 = scalar_lea.hbm %s2759_s7, %s1452_s6  ;;  %p1674_p3 = pneg %p1673_p13 }
 0x293   : > { %p1680_p2 = por %p1679_p8, %p1678_p4 }
 0x294   : > { %1210 = vst [vmem:[%s231_s12] sm:$0xff] %v1172_v4  ;;  %v1209_v17 = vadd.f32 %v1208_v42, %v1207_v40 }
 0x295   : > { %p1681_p6 = pnand %p1680_p2, %p1674_p3 }
 0x297   : > { %1684 = shalt.err (!%p1681_p6)
}
 0x298   : > { %s1685_s6 = scalar_lea.hbm %s2624_s27, 128  ;;  %s1689_s22 = scalar_lea.hbm %s2728_s3, 512 }
 0x299   : > { %p1686_p9 = scmp.ne.s32.totalorder %s2624_s27, %s1685_s6  ;;  %p1690_p12 = scmp.lt.u32.totalorder %s2624_s27, %s2728_s3 }
 0x29a   : > { %p1691_p5 = scmp.lt.u32.totalorder %s1689_s22, %s1685_s6  ;;  %p1693_p3 = scmp.lt.u32.totalorder %s1685_s6, %s2624_s27 }
 0x29b   : > { %p1687_p10 = pnand %p1686_p9, %p1976_p0 }
 0x29c   : > { %p1692_p13 = por %p1691_p5, %p1690_p12 }
 0x29d   : > { %p1688_p11 = pneg %p1687_p10 }
 0x29e   : > { %p1694_p4 = por %p1693_p3, %p1692_p13 }
 0x2a0   : > { %p1695_p8 = pnand %p1694_p4, %p1688_p11 }
 0x2a2   : > { %1698 = shalt.err (!%p1695_p8)
}
 0x2a3   : > { %1530 = dma.vmem_to_hbm [thread:$0]  (%p1976_p0), %s2626_s5, 128, %s2624_s27, %s1218_s21  }
 0x2a4   : > { %s2760_s0 = scalar_lea.vmem [#allocation6], %s2610_s13  ;;  %s1699_s1 = scalar_lea.vmem %s2633_s30, 128 }
 0x2a5   : > { %1211 = vst [vmem:[%s2760_s0] sm:$0xff] %v1209_v17  ;;  %p1700_p2 = scmp.ne.s32.totalorder %s2633_s30, %s1699_s1  ;;  %s1834_s6 = smov [#allocation6]  }
 0x2a6   : > { %s1703_s12 = sshll.u32 %s1834_s6, 4  ;;  %s1704_s12 = int_to_ptr.vmem [resolvable:$false] %s1703_s12 }
 0x2a7   : > { %p1701_p6 = pnand %p1700_p2, %p1976_p0  ;;  %s1705_s9 = scalar_lea.vmem %s1704_s12, 256 }
 0x2a8   : > { %p1706_p10 = scmp.lt.s32.totalorder %s2633_s30, %s1704_s12  ;;  %p1707_p11 = scmp.lt.s32.totalorder %s1705_s9, %s1699_s1 }
 0x2a9   : > { %p1702_p9 = pneg %p1701_p6 }
 0x2aa   : > { %p1708_p12 = por %p1707_p11, %p1706_p10 }
 0x2ac   : > { %p1709_p5 = pnand %p1708_p12, %p1702_p9 }
 0x2ae   : > { %1712 = shalt.err (!%p1709_p5)
}
 0x2af   : > { %s1713_s13 = scalar_lea.hbm %s2631_s8, 128  ;;  %s1717_s22 = scalar_lea.hbm %s2759_s7, 512 }
 0x2b0   : > { %p1714_p13 = scmp.ne.s32.totalorder %s2631_s8, %s1713_s13  ;;  %p1718_p8 = scmp.lt.u32.totalorder %s2631_s8, %s2759_s7 }
 0x2b1   : > { %p1719_p2 = scmp.lt.u32.totalorder %s1717_s22, %s1713_s13  ;;  %p1721_p9 = scmp.lt.u32.totalorder %s1713_s13, %s2631_s8 }
 0x2b2   : > { %p1715_p3 = pnand %p1714_p13, %p1976_p0 }
 0x2b3   : > { %p1720_p6 = por %p1719_p2, %p1718_p8 }
 0x2b4   : > { %p1716_p4 = pneg %p1715_p3 }
 0x2b5   : > { %p1722_p10 = por %p1721_p9, %p1720_p6 }
 0x2b7   : > { %p1723_p11 = pnand %p1722_p10, %p1716_p4 }
 0x2b9   : > { %1726 = shalt.err (!%p1723_p11)
}
 0x2ba   : > { %1531 = dma.vmem_to_hbm [thread:$0]  (%p1976_p0), %s2633_s30, 128, %s2631_s8, %s1218_s21  }
 0x2bb PF: > { %s2761_s0 = sld [smem:[#allocation9_spill]]  ;;  %p1545_p12 = scmp.ge.s32.totalorder %s1821_s25, 2 }
 0x2bd   : > { %p1536_p5 = pnand %p1545_p12, %p1951_p7 }
 0x2c1   : > { %s1283_s1 = sand.u32 1, %s2761_s0  }
 0x2c2   : > { %s1284_s6 = scalar_lea.sflag [#allocation3], %s1283_s1 }
 0x2c3   : > { %1772 = dma.done.wait (!%p1536_p5), %s1284_s6, 2048  }
 0x2c4   : > { %1774 = vsyncadd (!%p1536_p5), %s1284_s6, 4294965248  ;;  %s2762_s12 = sadd.s32 4294967294, %s1821_s25   ;;  %p1539_p13 = pnand %p1545_p12, %p1982_p1 }
 0x2c5   : > { %s1292_s23 = sand.u32 1, %s2762_s12  }
 0x2c6   : > { %s1293_s26 = scalar_lea.sflag [#allocation5], %s1292_s23 }
 0x2c7   : > { %1776 = dma.done.wait (!%p1539_p13), %s1293_s26, 256  }
 0x2c8   : > { %1778 = vsyncadd (!%p1539_p13), %s1293_s26, 4294967040  ;;  %s21_s25 = sadd.s32 1, %s1821_s25   ;;  %s2763_s21 = sld [smem:[#allocation10_spill]] }
 0x2c9   : > { %p18_p0 = scmp.ge.s32.totalorder %s21_s25, 6   ;;  %s2764_s15 = smov %s1785_s16 }
 0x2ca   : > { %s2765_s16 = smov %s1789_s17  ;;  %s2766_s17 = smov %s1963_s18 }
 0x2cb   : > { %s2767_s18 = smov %s1797_s19  ;;  %s2768_s19 = smov %s1801_s20 }
 0x2cc   : > { %s2769_s20 = smov %s1966_s4  ;;  %s2770_s22 = smov %s1817_s24 }
 0x2cd   : > { %s2771_s23 = smov %s2774_s28  ;;  %s2772_s24 = smov %s2778_s29 }
 0x2ce   :  { %20 = sbr.rel (!%p18_p0) target bundleno = 13 (0xd), region = 95 }
 0x2d5   :  { %1307 = vsyncpa [#allocation3], 1 }
 0x2d6   :  { %1309 = vsyncpa [#allocation3 + $0x1], 1 }
 0x2d7   :  { %1310 = vsyncpa [#allocation5], 1 }
 0x2d8   :  { %1312 = vsyncpa [#allocation5 + $0x1], 1 }

</bundles_post_ra>
